<compile_context>
chip_gen: v7x
topology: tpu7x:2x2x1
jax: 0.10.0
libtpu: 0.0.40
codegen_flags: <defaults>
</compile_context>

<pallas_src>
import jax
import jax.numpy as jnp
from jax.experimental import pallas as pl
from jax.experimental.pallas import tpu as pltpu


def _ceil_to(x, m):
    return ((x + m - 1) // m) * m


def _pick_tile(m, tile_max, align=16):
    """Largest `align`-multiple tile <= tile_max that still gives >= 2 grid
    steps (lets ("parallel",) shard across both TensorCores on megacore parts)
    and keeps the padded tail small."""
    if m <= align:
        return align
    half = _ceil_to(-(-m // 2), align)
    return max(align, min(_ceil_to(tile_max, align), half))


# ---------------------------------------------------------------------------
# Pallas kernels
# ---------------------------------------------------------------------------
def _conv_relu_pool_kernel(p_ref, w_ref, b_ref, o_ref):
    """Fused conv-as-matmul + bias + ReLU + 2x2 max-pool epilogue.

    p_ref: (4, tm, K) bf16 patch planes (one per pooling-window corner)
    w_ref: (K, Cout) bf16, b_ref: (1, Cout) f32, o_ref: (tm, Cout).
    Computes  max_q relu(p_q @ w + b) == relu(max_q(p_q @ w) + b).
    """
    _, tm, k = p_ref.shape
    # One long MXU pass over all 4 pooling corners (corner axis is major, so
    # the reshape is layout-preserving: pure leading-dim merge).
    y = jnp.dot(p_ref[...].reshape(4 * tm, k), w_ref[...],
                preferred_element_type=jnp.float32)            # (4*tm, Cout)
    # Max over the 4 corners (cheap VPU selects), then bias + ReLU.
    m = jnp.maximum(jnp.maximum(y[0 * tm:1 * tm], y[1 * tm:2 * tm]),
                    jnp.maximum(y[2 * tm:3 * tm], y[3 * tm:4 * tm]))
    m = jnp.maximum(m + b_ref[...], 0.0)
    o_ref[...] = m.astype(o_ref.dtype)


def conv_relu_pool(p4, w, b, *, tile_m=1024, out_dtype=jnp.bfloat16):
    """p4: (4, Mp, K) bf16, w: (K, Cout) bf16, b: (1, Cout) f32 -> (Mp, Cout)."""
    _, mp, k = p4.shape
    cout = w.shape[1]
    tm = _pick_tile(mp, tile_m)
    mpad = _ceil_to(mp, tm)
    if mpad != mp:
        p4 = jnp.pad(p4, ((0, 0), (0, mpad - mp), (0, 0)))
    out = pl.pallas_call(
        _conv_relu_pool_kernel,
        out_shape=jax.ShapeDtypeStruct((mpad, cout), out_dtype),
        grid=(mpad // tm,),
        in_specs=[
            pl.BlockSpec((4, tm, k), lambda i: (0, i, 0)),   # M-tiled patches
            pl.BlockSpec((k, cout), lambda i: (0, 0)),        # resident weight
            pl.BlockSpec((1, cout), lambda i: (0, 0)),        # resident bias
        ],
        out_specs=pl.BlockSpec((tm, cout), lambda i: (i, 0)),
        compiler_params=pltpu.CompilerParams(
            dimension_semantics=("parallel",)),
    )(p4, w, b)
    return out[:mp]


def _fc_chain_kernel(a_ref, w1_ref, b1_ref, w2_ref, b2_ref, w3_ref, b3_ref,
                     o_ref):
    h = jnp.dot(a_ref[...], w1_ref[...], preferred_element_type=jnp.float32)
    h = jnp.maximum(h + b1_ref[...], 0.0).astype(jnp.bfloat16)
    h = jnp.dot(h, w2_ref[...], preferred_element_type=jnp.float32)
    h = jnp.maximum(h + b2_ref[...], 0.0).astype(jnp.bfloat16)
    h = jnp.dot(h, w3_ref[...], preferred_element_type=jnp.float32)
    o_ref[...] = (h + b3_ref[...]).astype(o_ref.dtype)


def fc_chain(a, w1, b1, w2, b2, w3, b3, *, tile_b=256):
    """Fused fc1 -> ReLU -> fc2 -> ReLU -> fc3 on 128-padded N dims.
    a: (B, K) bf16 -> (B, N3) f32 (caller slices the real logits)."""
    B, K = a.shape
    n1, n2, n3 = w1.shape[1], w2.shape[1], w3.shape[1]
    tb = _pick_tile(B, tile_b)
    bpad = _ceil_to(B, tb)
    if bpad != B:
        a = jnp.pad(a, ((0, bpad - B), (0, 0)))
    out = pl.pallas_call(
        _fc_chain_kernel,
        out_shape=jax.ShapeDtypeStruct((bpad, n3), jnp.float32),
        grid=(bpad // tb,),
        in_specs=[
            pl.BlockSpec((tb, K), lambda i: (i, 0)),
            pl.BlockSpec((K, n1), lambda i: (0, 0)),
            pl.BlockSpec((1, n1), lambda i: (0, 0)),
            pl.BlockSpec((n1, n2), lambda i: (0, 0)),
            pl.BlockSpec((1, n2), lambda i: (0, 0)),
            pl.BlockSpec((n2, n3), lambda i: (0, 0)),
            pl.BlockSpec((1, n3), lambda i: (0, 0)),
        ],
        out_specs=pl.BlockSpec((tb, n3), lambda i: (i, 0)),
        compiler_params=pltpu.CompilerParams(
            dimension_semantics=("parallel",)),
    )(a, w1, b1, w2, b2, w3, b3)
    return out[:B]


# ---------------------------------------------------------------------------
# Glue: im2col / pooling-corner extraction, parameter packing, forward pass
# ---------------------------------------------------------------------------
def im2col(x, kh, kw):
    """x: (B, H, W, C) -> (B, Ho, Wo, kh*kw*C). Patch feature order is (kh, kw, C)."""
    B, H, W, C = x.shape
    Ho, Wo = H - kh + 1, W - kw + 1
    cols = [x[:, i:i + Ho, j:j + Wo, :] for i in range(kh) for j in range(kw)]
    return jnp.concatenate(cols, axis=-1)


def pooled_corner_patches(x, kh, kw):
    """(4, B*Hp*Wp, kh*kw*C): im2col patches at the 4 corners (2ph+di, 2pw+dj)
    of every 2x2 pooling window of the conv output."""
    pf = im2col(x, kh, kw)
    B, Ho, Wo, K = pf.shape
    Hp, Wp = Ho // 2, Wo // 2
    corners = [pf[:, di::2, dj::2, :].reshape(B * Hp * Wp, K)
               for di in (0, 1) for dj in (0, 1)]
    return jnp.stack(corners, axis=0)


def conv_w_to_mat(w):
    """torch conv weight (Cout, Cin, KH, KW) -> (KH*KW*Cin, Cout) matching im2col."""
    Cout, Cin, KH, KW = w.shape
    return jnp.transpose(w, (2, 3, 1, 0)).reshape(KH * KW * Cin, Cout)


def init_params(key):
    """Deterministic init mimicking PyTorch's default U(-1/sqrt(fan_in), ...)."""
    def uniform(k, shape, fan_in):
        bound = 1.0 / (fan_in ** 0.5)
        return jax.random.uniform(k, shape, jnp.float32, -bound, bound)

    ks = jax.random.split(key, 10)
    return {
        "conv1_w": uniform(ks[0], (16, 3, 5, 5), 3 * 25),
        "conv1_b": uniform(ks[1], (16,), 3 * 25),
        "conv2_w": uniform(ks[2], (32, 16, 5, 5), 16 * 25),
        "conv2_b": uniform(ks[3], (32,), 16 * 25),
        "fc1_w": uniform(ks[4], (120, 32 * 5 * 5), 32 * 5 * 5),
        "fc1_b": uniform(ks[5], (120,), 32 * 5 * 5),
        "fc2_w": uniform(ks[6], (84, 120), 120),
        "fc2_b": uniform(ks[7], (84,), 120),
        "fc3_w": uniform(ks[8], (10, 84), 84),
        "fc3_b": uniform(ks[9], (10,), 84),
    }


def prepare_params(p):
    """One-time (outside jit) conversion to kernel-ready layout.

    - conv weights -> (K, Cout) bf16 im2col matrices; conv2 Cout padded 32->128
      with zero columns / zero bias so the kernel's store path is lane-dense.
    - fc1 weight permuted so it consumes the conv2 output in its native
      (hw-major, 128-padded-channel) flatten order (padded channels hit zero
      weight rows -> exact), N padded 120->128.
    - fc2/fc3 zero-padded to (128, 128) (ReLU(0)=0 and zero K rows keep the
      math exact); real logits live in the first 10 output columns.
    """
    f32 = jnp.float32
    bf = jnp.bfloat16

    c1w = conv_w_to_mat(p["conv1_w"]).astype(bf)                       # (75, 16)
    c1b = p["conv1_b"].reshape(1, -1).astype(f32)

    c2w = conv_w_to_mat(p["conv2_w"])                                  # (400, 32)
    c2w = jnp.pad(c2w, ((0, 0), (0, 128 - 32))).astype(bf)             # (400, 128)
    c2b = jnp.pad(p["conv2_b"], (0, 128 - 32)).reshape(1, -1).astype(f32)

    # fc1: torch index k = c*25 + hw  ->  our index (hw*128 + c), N 120->128.
    w1 = p["fc1_w"].reshape(120, 32, 25)                               # (o, c, hw)
    w1 = jnp.transpose(w1, (2, 1, 0))                                  # (hw, c, o)
    w1p = jnp.zeros((25, 128, 128), f32).at[:, :32, :120].set(w1)
    w1p = w1p.reshape(25 * 128, 128).astype(bf)                        # (3200, 128)
    b1 = jnp.pad(p["fc1_b"], (0, 128 - 120)).reshape(1, -1).astype(f32)

    w2 = jnp.zeros((128, 128), f32).at[:120, :84].set(p["fc2_w"].T).astype(bf)
    b2 = jnp.pad(p["fc2_b"], (0, 128 - 84)).reshape(1, -1).astype(f32)

    w3 = jnp.zeros((128, 128), f32).at[:84, :10].set(p["fc3_w"].T).astype(bf)
    b3 = jnp.pad(p["fc3_b"], (0, 128 - 10)).reshape(1, -1).astype(f32)

    return {
        "conv1_wm": c1w, "conv1_b": c1b,
        "conv2_wm": c2w, "conv2_b": c2b,
        "fc1_wm": w1p, "fc1_b": b1,
        "fc2_wm": w2, "fc2_b": b2,
        "fc3_wm": w3, "fc3_b": b3,
    }


@jax.jit
def cnn_forward(x_nchw, P):
    B = x_nchw.shape[0]
    x = jnp.transpose(x_nchw, (0, 2, 3, 1)).astype(jnp.bfloat16)  # NCHW -> NHWC

    # conv1 (3->16, 5x5) + ReLU + 2x2 maxpool — one fused kernel
    p1 = pooled_corner_patches(x, 5, 5)                      # (4, B*196, 75)
    y = conv_relu_pool(p1, P["conv1_wm"], P["conv1_b"])      # (B*196, 16) bf16
    y = y.reshape(B, 14, 14, 16)

    # conv2 (16->32, 5x5; Cout padded to 128) + ReLU + 2x2 maxpool — fused kernel
    p2 = pooled_corner_patches(y, 5, 5)                      # (4, B*25, 400)
    y = conv_relu_pool(p2, P["conv2_wm"], P["conv2_b"])      # (B*25, 128) bf16

    # Flatten: row order is (b, hp, wp), channels already lane-padded to 128.
    # fc1's weight was pre-permuted to this layout, so no transpose / slice.
    a = y.reshape(B, 25 * 128)                               # (B, 3200) bf16

    # fc1 -> relu -> fc2 -> relu -> fc3 — one fused kernel (N padded to 128)
    logits = fc_chain(a, P["fc1_wm"], P["fc1_b"], P["fc2_wm"], P["fc2_b"],
                      P["fc3_wm"], P["fc3_b"])               # (B, 128) f32
    return logits[:, :10]


if __name__ == "__main__":
    key = jax.random.PRNGKey(0)
    pkey, xkey = jax.random.split(key)
    params = prepare_params(init_params(pkey))

    # CIFAR-style input: the view(-1, 32*5*5) in forward() fixes spatial to 32x32.
    x = jax.random.normal(xkey, (2, 3, 32, 32), jnp.float32)

    out = cnn_forward(x, params)
    jax.block_until_ready(out)
    assert out.shape == (2, 10) and out.dtype == jnp.float32
    assert bool(jnp.all(jnp.isfinite(out)))
    print("KERNEL_OK")
</pallas_src>

<mosaic_0001>
module attributes {stable_mosaic.version = 11 : i64} {
  func.func @_conv_relu_pool_kernel(%arg0: i32, %arg1: memref<4x208x75xbf16, #tpu.memory_space<vmem>>, %arg2: memref<75x16xbf16, #tpu.memory_space<vmem>>, %arg3: memref<1x16xf32, #tpu.memory_space<vmem>>, %arg4: memref<208x16xbf16, #tpu.memory_space<vmem>>) attributes {dimension_semantics = [#tpu.dimension_semantics<parallel>], iteration_bounds = array<i64: 2>, scalar_prefetch = 0 : i64, scratch_operands = 0 : i64, tpu.core_type = #tpu.core_type<tc>, window_params = [{transform_indices = @transform_0, window_bounds = array<i64: 4, 208, 75>}, {pipeline_mode = #tpu.pipeline_mode<synchronous>, transform_indices = @transform_1, window_bounds = array<i64: 75, 16>}, {pipeline_mode = #tpu.pipeline_mode<synchronous>, transform_indices = @transform_2, window_bounds = array<i64: 1, 16>}, {transform_indices = @transform_3, window_bounds = array<i64: 208, 16>}]} {
    %c0 = arith.constant 0 : index
    %c0_0 = arith.constant 0 : index
    %c0_1 = arith.constant 0 : index
    %0 = vector.load %arg1[%c0, %c0_0, %c0_1] : memref<4x208x75xbf16, #tpu.memory_space<vmem>>, vector<4x208x75xbf16>
    %1 = vector.shape_cast %0 : vector<4x208x75xbf16> to vector<832x75xbf16>
    %c0_2 = arith.constant 0 : index
    %c0_3 = arith.constant 0 : index
    %2 = vector.load %arg2[%c0_2, %c0_3] : memref<75x16xbf16, #tpu.memory_space<vmem>>, vector<75x16xbf16>
    %cst = arith.constant dense<0.000000e+00> : vector<832x16xf32>
    %3 = tpu.matmul %1, %2, %cst {dimension_numbers = #tpu.dot_dimension_numbers<[1], [0], [0], [1], [0, 0, 1, 1], [], []>} : vector<832x75xbf16>, vector<75x16xbf16>, vector<832x16xf32> -> vector<832x16xf32>
    %4 = vector.extract_strided_slice %3 {offsets = [0, 0], sizes = [208, 16], strides = [1, 1]} : vector<832x16xf32> to vector<208x16xf32>
    %5 = vector.extract_strided_slice %3 {offsets = [208, 0], sizes = [208, 16], strides = [1, 1]} : vector<832x16xf32> to vector<208x16xf32>
    %6 = arith.maximumf %4, %5 : vector<208x16xf32>
    %7 = vector.extract_strided_slice %3 {offsets = [416, 0], sizes = [208, 16], strides = [1, 1]} : vector<832x16xf32> to vector<208x16xf32>
    %8 = vector.extract_strided_slice %3 {offsets = [624, 0], sizes = [208, 16], strides = [1, 1]} : vector<832x16xf32> to vector<208x16xf32>
    %9 = arith.maximumf %7, %8 : vector<208x16xf32>
    %10 = arith.maximumf %6, %9 : vector<208x16xf32>
    %c0_4 = arith.constant 0 : index
    %c0_5 = arith.constant 0 : index
    %11 = vector.load %arg3[%c0_4, %c0_5] : memref<1x16xf32, #tpu.memory_space<vmem>>, vector<1x16xf32>
    %12 = vector.broadcast %11 : vector<1x16xf32> to vector<208x16xf32>
    %13 = arith.addf %10, %12 : vector<208x16xf32>
    %cst_6 = arith.constant 0.000000e+00 : f32
    %14 = vector.broadcast %cst_6 : f32 to vector<208x16xf32>
    %15 = arith.maximumf %13, %14 : vector<208x16xf32>
    %16 = arith.truncf %15 : vector<208x16xf32> to vector<208x16xbf16>
    %c0_7 = arith.constant 0 : index
    %c0_8 = arith.constant 0 : index
    %17 = vector.load %arg4[%c0_7, %c0_8] : memref<208x16xbf16, #tpu.memory_space<vmem>>, vector<208x16xbf16>
    tpu.vector_store %arg4[%c0_7, %c0_8], %16 {strides = array<i32>} : memref<208x16xbf16, #tpu.memory_space<vmem>>, vector<208x16xbf16>,
    return
  }
  func.func @transform_0(%arg0: i32) -> (i32, i32, i32) {
    %c0_i32 = arith.constant 0 : i32
    %c0_i32_0 = arith.constant 0 : i32
    %c0_i32_1 = arith.constant 0 : i32
    return %c0_i32, %arg0, %c0_i32_0 : i32, i32, i32
  }
  func.func @transform_1(%arg0: i32) -> (i32, i32) {
    %c0_i32 = arith.constant 0 : i32
    %c0_i32_0 = arith.constant 0 : i32
    %c0_i32_1 = arith.constant 0 : i32
    return %c0_i32, %c0_i32_0 : i32, i32
  }
  func.func @transform_2(%arg0: i32) -> (i32, i32) {
    %c0_i32 = arith.constant 0 : i32
    %c0_i32_0 = arith.constant 0 : i32
    %c0_i32_1 = arith.constant 0 : i32
    return %c0_i32, %c0_i32_0 : i32, i32
  }
  func.func @transform_3(%arg0: i32) -> (i32, i32) {
    %c0_i32 = arith.constant 0 : i32
    %c0_i32_0 = arith.constant 0 : i32
    return %arg0, %c0_i32 : i32, i32
  }
}

module attributes {stable_mosaic.version = 11 : i64} {
  func.func @_conv_relu_pool_kernel(%arg0: i32, %arg1: memref<4x32x400xbf16, #tpu.memory_space<vmem>>, %arg2: memref<400x128xbf16, #tpu.memory_space<vmem>>, %arg3: memref<1x128xf32, #tpu.memory_space<vmem>>, %arg4: memref<32x128xbf16, #tpu.memory_space<vmem>>) attributes {dimension_semantics = [#tpu.dimension_semantics<parallel>], iteration_bounds = array<i64: 2>, scalar_prefetch = 0 : i64, scratch_operands = 0 : i64, tpu.core_type = #tpu.core_type<tc>, window_params = [{transform_indices = @transform_0, window_bounds = array<i64: 4, 32, 400>}, {pipeline_mode = #tpu.pipeline_mode<synchronous>, transform_indices = @transform_1, window_bounds = array<i64: 400, 128>}, {pipeline_mode = #tpu.pipeline_mode<synchronous>, transform_indices = @transform_2, window_bounds = array<i64: 1, 128>}, {transform_indices = @transform_3, window_bounds = array<i64: 32, 128>}]} {
    %c0 = arith.constant 0 : index
    %c0_0 = arith.constant 0 : index
    %c0_1 = arith.constant 0 : index
    %0 = vector.load %arg1[%c0, %c0_0, %c0_1] : memref<4x32x400xbf16, #tpu.memory_space<vmem>>, vector<4x32x400xbf16>
    %1 = vector.shape_cast %0 : vector<4x32x400xbf16> to vector<128x400xbf16>
    %c0_2 = arith.constant 0 : index
    %c0_3 = arith.constant 0 : index
    %2 = vector.load %arg2[%c0_2, %c0_3] : memref<400x128xbf16, #tpu.memory_space<vmem>>, vector<400x128xbf16>
    %cst = arith.constant dense<0.000000e+00> : vector<128x128xf32>
    %3 = tpu.matmul %1, %2, %cst {dimension_numbers = #tpu.dot_dimension_numbers<[1], [0], [0], [1], [0, 0, 1, 1], [], []>} : vector<128x400xbf16>, vector<400x128xbf16>, vector<128x128xf32> -> vector<128x128xf32>
    %4 = vector.extract_strided_slice %3 {offsets = [0, 0], sizes = [32, 128], strides = [1, 1]} : vector<128x128xf32> to vector<32x128xf32>
    %5 = vector.extract_strided_slice %3 {offsets = [32, 0], sizes = [32, 128], strides = [1, 1]} : vector<128x128xf32> to vector<32x128xf32>
    %6 = arith.maximumf %4, %5 : vector<32x128xf32>
    %7 = vector.extract_strided_slice %3 {offsets = [64, 0], sizes = [32, 128], strides = [1, 1]} : vector<128x128xf32> to vector<32x128xf32>
    %8 = vector.extract_strided_slice %3 {offsets = [96, 0], sizes = [32, 128], strides = [1, 1]} : vector<128x128xf32> to vector<32x128xf32>
    %9 = arith.maximumf %7, %8 : vector<32x128xf32>
    %10 = arith.maximumf %6, %9 : vector<32x128xf32>
    %c0_4 = arith.constant 0 : index
    %c0_5 = arith.constant 0 : index
    %11 = vector.load %arg3[%c0_4, %c0_5] : memref<1x128xf32, #tpu.memory_space<vmem>>, vector<1x128xf32>
    %12 = vector.broadcast %11 : vector<1x128xf32> to vector<32x128xf32>
    %13 = arith.addf %10, %12 : vector<32x128xf32>
    %cst_6 = arith.constant 0.000000e+00 : f32
    %14 = vector.broadcast %cst_6 : f32 to vector<32x128xf32>
    %15 = arith.maximumf %13, %14 : vector<32x128xf32>
    %16 = arith.truncf %15 : vector<32x128xf32> to vector<32x128xbf16>
    %c0_7 = arith.constant 0 : index
    %c0_8 = arith.constant 0 : index
    %17 = vector.load %arg4[%c0_7, %c0_8] : memref<32x128xbf16, #tpu.memory_space<vmem>>, vector<32x128xbf16>
    tpu.vector_store %arg4[%c0_7, %c0_8], %16 {strides = array<i32>} : memref<32x128xbf16, #tpu.memory_space<vmem>>, vector<32x128xbf16>,
    return
  }
  func.func @transform_0(%arg0: i32) -> (i32, i32, i32) {
    %c0_i32 = arith.constant 0 : i32
    %c0_i32_0 = arith.constant 0 : i32
    %c0_i32_1 = arith.constant 0 : i32
    return %c0_i32, %arg0, %c0_i32_0 : i32, i32, i32
  }
  func.func @transform_1(%arg0: i32) -> (i32, i32) {
    %c0_i32 = arith.constant 0 : i32
    %c0_i32_0 = arith.constant 0 : i32
    %c0_i32_1 = arith.constant 0 : i32
    return %c0_i32, %c0_i32_0 : i32, i32
  }
  func.func @transform_2(%arg0: i32) -> (i32, i32) {
    %c0_i32 = arith.constant 0 : i32
    %c0_i32_0 = arith.constant 0 : i32
    %c0_i32_1 = arith.constant 0 : i32
    return %c0_i32, %c0_i32_0 : i32, i32
  }
  func.func @transform_3(%arg0: i32) -> (i32, i32) {
    %c0_i32 = arith.constant 0 : i32
    %c0_i32_0 = arith.constant 0 : i32
    return %arg0, %c0_i32 : i32, i32
  }
}

module attributes {stable_mosaic.version = 11 : i64} {
  func.func @_fc_chain_kernel(%arg0: i32, %arg1: memref<16x3200xbf16, #tpu.memory_space<vmem>>, %arg2: memref<3200x128xbf16, #tpu.memory_space<vmem>>, %arg3: memref<1x128xf32, #tpu.memory_space<vmem>>, %arg4: memref<128x128xbf16, #tpu.memory_space<vmem>>, %arg5: memref<1x128xf32, #tpu.memory_space<vmem>>, %arg6: memref<128x128xbf16, #tpu.memory_space<vmem>>, %arg7: memref<1x128xf32, #tpu.memory_space<vmem>>, %arg8: memref<16x128xf32, #tpu.memory_space<vmem>>) attributes {dimension_semantics = [#tpu.dimension_semantics<parallel>], iteration_bounds = array<i64: 1>, scalar_prefetch = 0 : i64, scratch_operands = 0 : i64, tpu.core_type = #tpu.core_type<tc>, window_params = [{transform_indices = @transform_0, window_bounds = array<i64: 16, 3200>}, {pipeline_mode = #tpu.pipeline_mode<synchronous>, transform_indices = @transform_1, window_bounds = array<i64: 3200, 128>}, {pipeline_mode = #tpu.pipeline_mode<synchronous>, transform_indices = @transform_2, window_bounds = array<i64: 1, 128>}, {pipeline_mode = #tpu.pipeline_mode<synchronous>, transform_indices = @transform_3, window_bounds = array<i64: 128, 128>}, {pipeline_mode = #tpu.pipeline_mode<synchronous>, transform_indices = @transform_4, window_bounds = array<i64: 1, 128>}, {pipeline_mode = #tpu.pipeline_mode<synchronous>, transform_indices = @transform_5, window_bounds = array<i64: 128, 128>}, {pipeline_mode = #tpu.pipeline_mode<synchronous>, transform_indices = @transform_6, window_bounds = array<i64: 1, 128>}, {transform_indices = @transform_7, window_bounds = array<i64: 16, 128>}]} {
    %c0 = arith.constant 0 : index
    %c0_0 = arith.constant 0 : index
    %0 = vector.load %arg1[%c0, %c0_0] : memref<16x3200xbf16, #tpu.memory_space<vmem>>, vector<16x3200xbf16>
    %c0_1 = arith.constant 0 : index
    %c0_2 = arith.constant 0 : index
    %1 = vector.load %arg2[%c0_1, %c0_2] : memref<3200x128xbf16, #tpu.memory_space<vmem>>, vector<3200x128xbf16>
    %cst = arith.constant dense<0.000000e+00> : vector<16x128xf32>
    %2 = tpu.matmul %0, %1, %cst {dimension_numbers = #tpu.dot_dimension_numbers<[1], [0], [0], [1], [0, 0, 1, 1], [], []>} : vector<16x3200xbf16>, vector<3200x128xbf16>, vector<16x128xf32> -> vector<16x128xf32>
    %c0_3 = arith.constant 0 : index
    %c0_4 = arith.constant 0 : index
    %3 = vector.load %arg3[%c0_3, %c0_4] : memref<1x128xf32, #tpu.memory_space<vmem>>, vector<1x128xf32>
    %4 = vector.broadcast %3 : vector<1x128xf32> to vector<16x128xf32>
    %5 = arith.addf %2, %4 : vector<16x128xf32>
    %cst_5 = arith.constant 0.000000e+00 : f32
    %6 = vector.broadcast %cst_5 : f32 to vector<16x128xf32>
    %7 = arith.maximumf %5, %6 : vector<16x128xf32>
    %8 = arith.truncf %7 : vector<16x128xf32> to vector<16x128xbf16>
    %c0_6 = arith.constant 0 : index
    %c0_7 = arith.constant 0 : index
    %9 = vector.load %arg4[%c0_6, %c0_7] : memref<128x128xbf16, #tpu.memory_space<vmem>>, vector<128x128xbf16>
    %cst_8 = arith.constant dense<0.000000e+00> : vector<16x128xf32>
    %10 = tpu.matmul %8, %9, %cst_8 {dimension_numbers = #tpu.dot_dimension_numbers<[1], [0], [0], [1], [0, 0, 1, 1], [], []>} : vector<16x128xbf16>, vector<128x128xbf16>, vector<16x128xf32> -> vector<16x128xf32>
    %c0_9 = arith.constant 0 : index
    %c0_10 = arith.constant 0 : index
    %11 = vector.load %arg5[%c0_9, %c0_10] : memref<1x128xf32, #tpu.memory_space<vmem>>, vector<1x128xf32>
    %12 = vector.broadcast %11 : vector<1x128xf32> to vector<16x128xf32>
    %13 = arith.addf %10, %12 : vector<16x128xf32>
    %cst_11 = arith.constant 0.000000e+00 : f32
    %14 = vector.broadcast %cst_11 : f32 to vector<16x128xf32>
    %15 = arith.maximumf %13, %14 : vector<16x128xf32>
    %16 = arith.truncf %15 : vector<16x128xf32> to vector<16x128xbf16>
    %c0_12 = arith.constant 0 : index
    %c0_13 = arith.constant 0 : index
    %17 = vector.load %arg6[%c0_12, %c0_13] : memref<128x128xbf16, #tpu.memory_space<vmem>>, vector<128x128xbf16>
    %cst_14 = arith.constant dense<0.000000e+00> : vector<16x128xf32>
    %18 = tpu.matmul %16, %17, %cst_14 {dimension_numbers = #tpu.dot_dimension_numbers<[1], [0], [0], [1], [0, 0, 1, 1], [], []>} : vector<16x128xbf16>, vector<128x128xbf16>, vector<16x128xf32> -> vector<16x128xf32>
    %c0_15 = arith.constant 0 : index
    %c0_16 = arith.constant 0 : index
    %19 = vector.load %arg7[%c0_15, %c0_16] : memref<1x128xf32, #tpu.memory_space<vmem>>, vector<1x128xf32>
    %20 = vector.broadcast %19 : vector<1x128xf32> to vector<16x128xf32>
    %21 = arith.addf %18, %20 : vector<16x128xf32>
    %c0_17 = arith.constant 0 : index
    %c0_18 = arith.constant 0 : index
    %22 = vector.load %arg8[%c0_17, %c0_18] : memref<16x128xf32, #tpu.memory_space<vmem>>, vector<16x128xf32>
    tpu.vector_store %arg8[%c0_17, %c0_18], %21 {strides = array<i32>} : memref<16x128xf32, #tpu.memory_space<vmem>>, vector<16x128xf32>,
    return
  }
  func.func @transform_0(%arg0: i32) -> (i32, i32) {
    %c0_i32 = arith.constant 0 : i32
    %c0_i32_0 = arith.constant 0 : i32
    return %arg0, %c0_i32 : i32, i32
  }
  func.func @transform_1(%arg0: i32) -> (i32, i32) {
    %c0_i32 = arith.constant 0 : i32
    %c0_i32_0 = arith.constant 0 : i32
    %c0_i32_1 = arith.constant 0 : i32
    return %c0_i32, %c0_i32_0 : i32, i32
  }
  func.func @transform_2(%arg0: i32) -> (i32, i32) {
    %c0_i32 = arith.constant 0 : i32
    %c0_i32_0 = arith.constant 0 : i32
    %c0_i32_1 = arith.constant 0 : i32
    return %c0_i32, %c0_i32_0 : i32, i32
  }
  func.func @transform_3(%arg0: i32) -> (i32, i32) {
    %c0_i32 = arith.constant 0 : i32
    %c0_i32_0 = arith.constant 0 : i32
    %c0_i32_1 = arith.constant 0 : i32
    return %c0_i32, %c0_i32_0 : i32, i32
  }
  func.func @transform_4(%arg0: i32) -> (i32, i32) {
    %c0_i32 = arith.constant 0 : i32
    %c0_i32_0 = arith.constant 0 : i32
    %c0_i32_1 = arith.constant 0 : i32
    return %c0_i32, %c0_i32_0 : i32, i32
  }
  func.func @transform_5(%arg0: i32) -> (i32, i32) {
    %c0_i32 = arith.constant 0 : i32
    %c0_i32_0 = arith.constant 0 : i32
    %c0_i32_1 = arith.constant 0 : i32
    return %c0_i32, %c0_i32_0 : i32, i32
  }
  func.func @transform_6(%arg0: i32) -> (i32, i32) {
    %c0_i32 = arith.constant 0 : i32
    %c0_i32_0 = arith.constant 0 : i32
    %c0_i32_1 = arith.constant 0 : i32
    return %c0_i32, %c0_i32_0 : i32, i32
  }
  func.func @transform_7(%arg0: i32) -> (i32, i32) {
    %c0_i32 = arith.constant 0 : i32
    %c0_i32_0 = arith.constant 0 : i32
    return %arg0, %c0_i32 : i32, i32
  }
}

</mosaic_0001>

<bundles_post_ra>
// kernel: cnn_forward.3
= control target key start
LH: loop header
LB: loop body
LE: loop exit
PB: predicated region body
PF: predicated region fallthrough
CT: control target
= control target key end

     0   :  { %s2456_s12 = smov 0   ;;  %s2458_s13 = smov 0   ;;  %s2966_s0 = inlined_call_operand.vmem [shape: bf16[4,416,75], index: 0, kind: input, shape index: {}]   ;;  %s2967_s1 = inlined_call_operand.vmem [shape: bf16[75,16], index: 1, kind: input, shape index: {}]   ;;  %s2968_s2 = inlined_call_operand.vmem [shape: f32[1,16], index: 2, kind: input, shape index: {}]   ;;  %s2969_s3 = inlined_call_operand.vmem [shape: bf16[416,16], index: 3, kind: output, shape index: {}]  }
   0x1   :  { %s2460_s14 = smov 0  }
   0x2 LB: > { %s1974_s15 = sadd.s32 4294967295, %s2433_s14   ;;  %s2473_s16 = sadd.s32 1, %s2433_s14   ;;  %s2433_s14 = sphi %s2460_s14, %s2976_s14   ;;  %s2429_s13 = sphi %s2458_s13, %s2975_s13   ;;  %s2425_s12 = sphi %s2456_s12, %s2974_s12  }
   0x3   : > { %s17_s17 = ssub.s32 %s2433_s14, %s2473_s16  ;;  %s20_s18 = sadd.s32 1, %s2429_s13 }
   0x4   : > { %p18_p0 = scmp.eq.s32.totalorder %s17_s17, 0  ;;  %p27_p1 = scmp.ne.s32.totalorder %s2429_s13, %s2425_s12 }
   0x5   : > { %p28_p2 = scmp.eq.s32.totalorder %s2433_s14, 0  ;;  %p1977_p4 = scmp.ge.s32.totalorder %s2433_s14, 2 }
   0x6   : > { %s2482_s19 = scalar_select %p18_p0, %s2429_s13, %s20_s18  }
   0x7   : > { %p29_p3 = por %p28_p2, %p27_p1  ;;  %127 = sbr.rel (%p1977_p4) target bundleno = 45 (0x2d), region = 24 }
   0xe   : > { %130 = sbr.rel (!%p29_p3) target bundleno = 45 (0x2d), region = 28  ;;  %s132_s20 = sand.u32 (%p29_p3), 1, %s2429_s13  }
   0xf   : > { %s2119_s21 = smul.u32 (%p29_p3), 104, %s2433_s14 }
  0x10   : > { %s2327_s22 = smul.u32 (%p29_p3), 416, %s132_s20 }
  0x11   : > { %s2490_s25 = scalar_lea.vmem (%p29_p3), %s2966_s0, %s2119_s21 }
  0x12   : > { %v153_v0 = vld [vmem:[%s2490_s25] sm:$0xff] (%p29_p3)   ;;  %v157_v1 = vld [vmem:[%s2490_s25 + $0x8] sm:$0xff] (%p29_p3)   ;;  %v161_v2 = vld [vmem:[%s2490_s25 + $0x10] sm:$0xff] (%p29_p3)   ;;  %s2495_s26 = scalar_lea.vmem (%p29_p3), [#allocation2], %s2327_s22 }
  0x13   : > { %154 = vst [vmem:[%s2495_s26] sm:$0xff] (%p29_p3), %v153_v0   ;;  %158 = vst [vmem:[%s2495_s26 + $0x8] sm:$0xff] (%p29_p3), %v157_v1   ;;  %v165_v3 = vld [vmem:[%s2490_s25 + $0x18] sm:$0xff] (%p29_p3)   ;;  %v169_v4 = vld [vmem:[%s2490_s25 + $0x20] sm:$0xff] (%p29_p3)  }
  0x14   : > { %162 = vst [vmem:[%s2495_s26 + $0x10] sm:$0xff] (%p29_p3), %v161_v2   ;;  %v173_v5 = vld [vmem:[%s2490_s25 + $0x28] sm:$0xff] (%p29_p3)   ;;  %166 = vst [vmem:[%s2495_s26 + $0x18] sm:$0xff] (%p29_p3), %v165_v3   ;;  %v177_v6 = vld [vmem:[%s2490_s25 + $0x30] sm:$0xff] (%p29_p3)  }
  0x15   : > { %170 = vst [vmem:[%s2495_s26 + $0x20] sm:$0xff] %v169_v4   ;;  %174 = vst [vmem:[%s2495_s26 + $0x28] sm:$0xff] %v173_v5   ;;  %v181_v7 = vld [vmem:[%s2490_s25 + $0x38] sm:$0xff]   ;;  %v185_v8 = vld [vmem:[%s2490_s25 + $0x40] sm:$0xff]  }
  0x16   : > { %178 = vst [vmem:[%s2495_s26 + $0x30] sm:$0xff] %v177_v6   ;;  %182 = vst [vmem:[%s2495_s26 + $0x38] sm:$0xff] %v181_v7   ;;  %v189_v9 = vld [vmem:[%s2490_s25 + $0x48] sm:$0xff]   ;;  %v193_v10 = vld [vmem:[%s2490_s25 + $0x50] sm:$0xff]  }
  0x17   : > { %186 = vst [vmem:[%s2495_s26 + $0x40] sm:$0xff] %v185_v8   ;;  %v197_v11 = vld [vmem:[%s2490_s25 + $0x58] sm:$0xff]   ;;  %190 = vst [vmem:[%s2495_s26 + $0x48] sm:$0xff] %v189_v9   ;;  %v201_v12 = vld [vmem:[%s2490_s25 + $0x60] sm:$0xff]  }
  0x18   : > { %194 = vst [vmem:[%s2495_s26 + $0x50] sm:$0xff] %v193_v10   ;;  %198 = vst [vmem:[%s2495_s26 + $0x58] sm:$0xff] %v197_v11   ;;  %v205_v13 = vld [vmem:[%s2490_s25 + $0xd0] sm:$0xff]   ;;  %v209_v14 = vld [vmem:[%s2490_s25 + $0xd8] sm:$0xff]  }
  0x19   : > { %202 = vst [vmem:[%s2495_s26 + $0x60] sm:$0xff] %v201_v12   ;;  %206 = vst [vmem:[%s2495_s26 + $0x68] sm:$0xff] %v205_v13   ;;  %v213_v15 = vld [vmem:[%s2490_s25 + $0xe0] sm:$0xff]   ;;  %v217_v16 = vld [vmem:[%s2490_s25 + $0xe8] sm:$0xff]  }
  0x1a   : > { %210 = vst [vmem:[%s2495_s26 + $0x70] sm:$0xff] %v209_v14   ;;  %v221_v17 = vld [vmem:[%s2490_s25 + $0xf0] sm:$0xff]   ;;  %214 = vst [vmem:[%s2495_s26 + $0x78] sm:$0xff] %v213_v15   ;;  %v225_v18 = vld [vmem:[%s2490_s25 + $0xf8] sm:$0xff]  }
  0x1b   : > { %218 = vst [vmem:[%s2495_s26 + $0x80] sm:$0xff] %v217_v16   ;;  %222 = vst [vmem:[%s2495_s26 + $0x88] sm:$0xff] %v221_v17   ;;  %v229_v19 = vld [vmem:[%s2490_s25 + $0x100] sm:$0xff]   ;;  %v233_v20 = vld [vmem:[%s2490_s25 + $0x108] sm:$0xff]  }
  0x1c   : > { %226 = vst [vmem:[%s2495_s26 + $0x90] sm:$0xff] %v225_v18   ;;  %230 = vst [vmem:[%s2495_s26 + $0x98] sm:$0xff] %v229_v19   ;;  %v237_v21 = vld [vmem:[%s2490_s25 + $0x110] sm:$0xff]   ;;  %v241_v22 = vld [vmem:[%s2490_s25 + $0x118] sm:$0xff]  }
  0x1d   : > { %234 = vst [vmem:[%s2495_s26 + $0xa0] sm:$0xff] %v233_v20   ;;  %v245_v23 = vld [vmem:[%s2490_s25 + $0x120] sm:$0xff]   ;;  %238 = vst [vmem:[%s2495_s26 + $0xa8] sm:$0xff] %v237_v21   ;;  %v249_v24 = vld [vmem:[%s2490_s25 + $0x128] sm:$0xff]  }
  0x1e   : > { %242 = vst [vmem:[%s2495_s26 + $0xb0] sm:$0xff] %v241_v22   ;;  %246 = vst [vmem:[%s2495_s26 + $0xb8] sm:$0xff] %v245_v23   ;;  %v253_v25 = vld [vmem:[%s2490_s25 + $0x130] sm:$0xff]   ;;  %v257_v26 = vld [vmem:[%s2490_s25 + $0x1a0] sm:$0xff]  }
  0x1f   : > { %250 = vst [vmem:[%s2495_s26 + $0xc0] sm:$0xff] %v249_v24   ;;  %254 = vst [vmem:[%s2495_s26 + $0xc8] sm:$0xff] %v253_v25   ;;  %v261_v27 = vld [vmem:[%s2490_s25 + $0x1a8] sm:$0xff]   ;;  %v265_v28 = vld [vmem:[%s2490_s25 + $0x1b0] sm:$0xff]  }
  0x20   : > { %258 = vst [vmem:[%s2495_s26 + $0xd0] sm:$0xff] %v257_v26   ;;  %v269_v29 = vld [vmem:[%s2490_s25 + $0x1b8] sm:$0xff]   ;;  %262 = vst [vmem:[%s2495_s26 + $0xd8] sm:$0xff] %v261_v27   ;;  %v273_v30 = vld [vmem:[%s2490_s25 + $0x1c0] sm:$0xff]  }
  0x21   : > { %266 = vst [vmem:[%s2495_s26 + $0xe0] sm:$0xff] %v265_v28   ;;  %270 = vst [vmem:[%s2495_s26 + $0xe8] sm:$0xff] %v269_v29   ;;  %v277_v31 = vld [vmem:[%s2490_s25 + $0x1c8] sm:$0xff]   ;;  %v281_v32 = vld [vmem:[%s2490_s25 + $0x1d0] sm:$0xff]  }
  0x22   : > { %274 = vst [vmem:[%s2495_s26 + $0xf0] sm:$0xff] %v273_v30   ;;  %278 = vst [vmem:[%s2495_s26 + $0xf8] sm:$0xff] %v277_v31   ;;  %v285_v33 = vld [vmem:[%s2490_s25 + $0x1d8] sm:$0xff]   ;;  %v289_v34 = vld [vmem:[%s2490_s25 + $0x1e0] sm:$0xff]  }
  0x23   : > { %282 = vst [vmem:[%s2495_s26 + $0x100] sm:$0xff] %v281_v32   ;;  %v293_v35 = vld [vmem:[%s2490_s25 + $0x1e8] sm:$0xff]   ;;  %286 = vst [vmem:[%s2495_s26 + $0x108] sm:$0xff] %v285_v33   ;;  %v297_v36 = vld [vmem:[%s2490_s25 + $0x1f0] sm:$0xff]  }
  0x24   : > { %290 = vst [vmem:[%s2495_s26 + $0x110] sm:$0xff] %v289_v34   ;;  %294 = vst [vmem:[%s2495_s26 + $0x118] sm:$0xff] %v293_v35   ;;  %v301_v37 = vld [vmem:[%s2490_s25 + $0x1f8] sm:$0xff]   ;;  %v305_v38 = vld [vmem:[%s2490_s25 + $0x200] sm:$0xff]  }
  0x25   : > { %298 = vst [vmem:[%s2495_s26 + $0x120] sm:$0xff] %v297_v36   ;;  %302 = vst [vmem:[%s2495_s26 + $0x128] sm:$0xff] %v301_v37   ;;  %v309_v39 = vld [vmem:[%s2490_s25 + $0x270] sm:$0xff]   ;;  %v313_v40 = vld [vmem:[%s2490_s25 + $0x278] sm:$0xff]  }
  0x26   : > { %306 = vst [vmem:[%s2495_s26 + $0x130] sm:$0xff] %v305_v38   ;;  %v317_v41 = vld [vmem:[%s2490_s25 + $0x280] sm:$0xff]   ;;  %310 = vst [vmem:[%s2495_s26 + $0x138] sm:$0xff] %v309_v39   ;;  %v321_v42 = vld [vmem:[%s2490_s25 + $0x288] sm:$0xff]  }
  0x27   : > { %314 = vst [vmem:[%s2495_s26 + $0x140] sm:$0xff] %v313_v40   ;;  %318 = vst [vmem:[%s2495_s26 + $0x148] sm:$0xff] %v317_v41   ;;  %v325_v43 = vld [vmem:[%s2490_s25 + $0x290] sm:$0xff]   ;;  %v329_v44 = vld [vmem:[%s2490_s25 + $0x298] sm:$0xff]  }
  0x28   : > { %322 = vst [vmem:[%s2495_s26 + $0x150] sm:$0xff] %v321_v42   ;;  %326 = vst [vmem:[%s2495_s26 + $0x158] sm:$0xff] %v325_v43   ;;  %v333_v45 = vld [vmem:[%s2490_s25 + $0x2a0] sm:$0xff]   ;;  %v337_v46 = vld [vmem:[%s2490_s25 + $0x2a8] sm:$0xff]  }
  0x29   : > { %330 = vst [vmem:[%s2495_s26 + $0x160] sm:$0xff] %v329_v44   ;;  %v341_v47 = vld [vmem:[%s2490_s25 + $0x2b0] sm:$0xff]   ;;  %334 = vst [vmem:[%s2495_s26 + $0x168] sm:$0xff] %v333_v45   ;;  %v345_v48 = vld [vmem:[%s2490_s25 + $0x2b8] sm:$0xff]  }
  0x2a   : > { %338 = vst [vmem:[%s2495_s26 + $0x170] sm:$0xff] %v337_v46   ;;  %342 = vst [vmem:[%s2495_s26 + $0x178] sm:$0xff] %v341_v47   ;;  %v349_v49 = vld [vmem:[%s2490_s25 + $0x2c0] sm:$0xff]   ;;  %v353_v50 = vld [vmem:[%s2490_s25 + $0x2c8] sm:$0xff]  }
  0x2b   : > { %346 = vst [vmem:[%s2495_s26 + $0x180] sm:$0xff] %v345_v48   ;;  %350 = vst [vmem:[%s2495_s26 + $0x188] sm:$0xff] %v349_v49   ;;  %v357_v51 = vld [vmem:[%s2490_s25 + $0x2d0] sm:$0xff]  }
  0x2c   : > { %354 = vst [vmem:[%s2495_s26 + $0x190] sm:$0xff] %v353_v50   ;;  %358 = vst [vmem:[%s2495_s26 + $0x198] sm:$0xff] %v357_v51  }
  0x2d PF: > { %p1979_p5 = scmp.ge.s32.totalorder %s2433_s14, 1  ;;  %p590_p6 = scmp.lt.s32.totalorder %s2433_s14, 3 }
  0x2f   : > { %p591_p7 = pnand %p1979_p5, %p590_p6 }
  0x31   : > { %594 = sbr.rel (%p591_p7) target bundleno = 399 (0x18f), region = 69 }
  0x38   : > { %v2354_v52 = vld [vmem:[%s2967_s1] sm:$0xff]   ;;  %v2355_v53 = vld [vmem:[%s2967_s1 + $0x8] sm:$0xff]   ;;  %vm1188_vm0 = vcmask 1044480   ;;  %v2356_v54 = vld [vmem:[%s2967_s1 + $0x10] sm:$0xff]   ;;  %s597_s6 = sand.u32 1, %s2425_s12   ;;  %vm1189_vm1 = vcmask 1045504  }
  0x39   : > { %2203 = vmatprep.subr.bf16.mxu0 %v2354_v52  ;;  %2317 = vmatprep.subr.bf16.mxu1 %v2354_v52  ;;  %v2435_v55 = vmov 65535   ;;  %s2328_s7 = smul.u32 416, %s597_s6  ;;  %v2357_v57 = vld [vmem:[%s2967_s1 + $0x18] sm:$0xff]   ;;  %v2358_v58 = vld [vmem:[%s2967_s1 + $0x20] sm:$0x3f]   ;;  %vm1031_vm2 = vcmask 613376  }
  0x3a   : > { %2204 = vmatpush3.bf16.msra.mxu0 %v2354_v52  ;;  %2322 = vmatpush3.bf16.msra.mxu1 %v2354_v52  ;;  %v1190_v56 = vsel %vm1188_vm0, 4294967295, %v2435_v55  ;;  %s621_s12 = smul.u32 26, %s1974_s15  ;;  %vm1885_vm3 = vcmask 125952  }
  0x3b   : > { %2205 = vmatprep.subr.bf16.mxu0 %v2355_v53  ;;  %2318 = vmatprep.subr.bf16.mxu1 %v2355_v53  ;;  %v1191_v59 = vsel %vm1189_vm1, %v1190_v56, 0  ;;  %s2616_s17 = scalar_lea.vmem [#allocation2], %s2328_s7 }
  0x3c   : > { %v2359_v60 = vld [vmem:[%s2616_s17] sm:$0xff]   ;;  %v2360_v61 = vld [vmem:[%s2616_s17 + $0xd0] sm:$0xff]   ;;  %v1193_v62 = vand.u32 %v2358_v58, %v1191_v59  ;;  %v2361_v63 = vld [vmem:[%s2616_s17 + $0x8] sm:$0xff]   ;;  %p622_p8 = scmp.lt.s32.totalorder %s621_s12, 51 }
  0x3d   : > { %2213 = vmatprep.mubr.msk.bf16.mxu0 %vm1031_vm2, %v2359_v60  ;;  %2265 = vmatprep.mubr.msk.bf16.mxu1 %vm1031_vm2, %v2360_v61  ;;  %v2362_v0 = vld [vmem:[%s2616_s17 + $0xd8] sm:$0xff]   ;;  %v2363_v1 = vld [vmem:[%s2616_s17 + $0x10] sm:$0xff]   ;;  %v2364_v2 = vld [vmem:[%s2616_s17 + $0xe0] sm:$0xff]  }
  0x3e   : > { %2206 = vmatpush3.bf16.msra.mxu0 %v2355_v53  ;;  %2323 = vmatpush3.bf16.msra.mxu1 %v2355_v53  ;;  %v2365_v3 = vld [vmem:[%s2616_s17 + $0x18] sm:$0xff]   ;;  %v2366_v4 = vld [vmem:[%s2616_s17 + $0xe8] sm:$0xff]   ;;  %v2367_v5 = vld [vmem:[%s2616_s17 + $0x20] sm:$0xff]   ;;  %s2978_s12 = smov (!%p622_p8, %s621_s12), 51 }
  0x3f   : > { %2207 = vmatprep.subr.bf16.mxu0 %v2356_v54  ;;  %2319 = vmatprep.subr.bf16.mxu1 %v2356_v54  ;;  %v2368_v6 = vld [vmem:[%s2616_s17 + $0xf0] sm:$0xff]   ;;  %v2369_v7 = vld [vmem:[%s2616_s17 + $0x28] sm:$0xff]   ;;  %v2370_v8 = vld [vmem:[%s2616_s17 + $0xf8] sm:$0xff]   ;;  %s1980_s18 = sshll.u32 %s2978_s12, 2 }
  0x40   : > { %v2371_v9 = vld [vmem:[%s2616_s17 + $0x30] sm:$0xff]   ;;  %v2372_v10 = vld [vmem:[%s2616_s17 + $0x100] sm:$0xff]   ;;  %v2373_v11 = vld [vmem:[%s2616_s17 + $0x38] sm:$0xff]   ;;  %s2830_s22 = scalar_lea.vmem %s2969_s3, %s1980_s18 }
  0x41   : > { %v2374_v12 = vld [vmem:[%s2616_s17 + $0x108] sm:$0xff]   ;;  %v2375_v13 = vld [vmem:[%s2616_s17 + $0x40] sm:$0xff]   ;;  %v2376_v14 = vld [vmem:[%s2616_s17 + $0x110] sm:$0xff]  }
  0x42   : > { %2208 = vmatpush3.bf16.msra.mxu0 %v2356_v54  ;;  %2324 = vmatpush3.bf16.msra.mxu1 %v2356_v54  ;;  %v2377_v15 = vld [vmem:[%s2616_s17 + $0x48] sm:$0xff]   ;;  %v2378_v16 = vld [vmem:[%s2616_s17 + $0x118] sm:$0xff]   ;;  %v2379_v17 = vld [vmem:[%s2616_s17 + $0x50] sm:$0xff]  }
  0x43   : > { %2209 = vmatprep.subr.bf16.mxu0 %v2357_v57  ;;  %2320 = vmatprep.subr.bf16.mxu1 %v2357_v57  ;;  %v2380_v18 = vld [vmem:[%s2616_s17 + $0x120] sm:$0xff]   ;;  %v2381_v19 = vld [vmem:[%s2616_s17 + $0x58] sm:$0xff]   ;;  %v2382_v20 = vld [vmem:[%s2616_s17 + $0x128] sm:$0xff]  }
  0x44   : > { %v2383_v21 = vld [vmem:[%s2616_s17 + $0x60] sm:$0xff]   ;;  %v2384_v22 = vld [vmem:[%s2616_s17 + $0x130] sm:$0xff]   ;;  %v2385_v23 = vld [vmem:[%s2616_s17 + $0x68] sm:$0xff]  }
  0x45   : > { %v2386_v24 = vld [vmem:[%s2616_s17 + $0x138] sm:$0xff]   ;;  %v2387_v25 = vld [vmem:[%s2616_s17 + $0x70] sm:$0xff]   ;;  %v2388_v26 = vld [vmem:[%s2616_s17 + $0x140] sm:$0xff]  }
  0x46   : > { %2210 = vmatpush3.bf16.msra.mxu0 %v2357_v57  ;;  %2325 = vmatpush3.bf16.msra.mxu1 %v2357_v57  ;;  %v2389_v27 = vld [vmem:[%s2616_s17 + $0x78] sm:$0xff]   ;;  %v2390_v28 = vld [vmem:[%s2616_s17 + $0x148] sm:$0xff]   ;;  %v2391_v29 = vld [vmem:[%s2616_s17 + $0x80] sm:$0xff]  }
  0x47   : > { %2211 = vmatprep.subr.bf16.mxu0 %v1193_v62  ;;  %2321 = vmatprep.subr.bf16.mxu1 %v1193_v62  ;;  %v2392_v30 = vld [vmem:[%s2616_s17 + $0x150] sm:$0xff]   ;;  %v2393_v31 = vld [vmem:[%s2616_s17 + $0x88] sm:$0xff]   ;;  %v2394_v32 = vld [vmem:[%s2616_s17 + $0x158] sm:$0xff]  }
  0x48   : > { %v2395_v33 = vld [vmem:[%s2616_s17 + $0x90] sm:$0xff]   ;;  %v2396_v34 = vld [vmem:[%s2616_s17 + $0x160] sm:$0xff]   ;;  %v2397_v35 = vld [vmem:[%s2616_s17 + $0x98] sm:$0xff]  }
  0x49   : > { %v2398_v36 = vld [vmem:[%s2616_s17 + $0x168] sm:$0xff]   ;;  %v2399_v37 = vld [vmem:[%s2616_s17 + $0xa0] sm:$0xff]   ;;  %v2400_v38 = vld [vmem:[%s2616_s17 + $0x170] sm:$0xff]  }
  0x4a   : > { %2212 = vmatpush3.bf16.msra.mxu0 %v1193_v62  ;;  %2326 = vmatpush3.bf16.msra.mxu1 %v1193_v62  ;;  %v2401_v39 = vld [vmem:[%s2616_s17 + $0xa8] sm:$0xff]   ;;  %v2402_v40 = vld [vmem:[%s2616_s17 + $0x178] sm:$0xff]   ;;  %v2403_v41 = vld [vmem:[%s2616_s17 + $0xb0] sm:$0xff]  }
  0x4b   : > { %v2404_v42 = vld [vmem:[%s2616_s17 + $0x180] sm:$0xff]   ;;  %v2405_v43 = vld [vmem:[%s2616_s17 + $0xb8] sm:$0xff]   ;;  %v2406_v44 = vld [vmem:[%s2616_s17 + $0x188] sm:$0xff]  }
  0x4c   : > { %v2407_v45 = vld [vmem:[%s2616_s17 + $0xc0] sm:$0xff]   ;;  %v2408_v46 = vld [vmem:[%s2616_s17 + $0x190] sm:$0xff]   ;;  %v2409_v47 = vld [vmem:[%s2616_s17 + $0xc8] sm:$0xff]  }
  0x4d   : > { %2214 = vmatmul.mubr.msk.bf16.vlgmr.msra.gmra.mrb[0].mxu0 %vm1031_vm2, %v2361_v63  ;;  %2266 = vmatmul.mubr.msk.bf16.vlgmr.msra.gmra.mrb[0].mxu1 %vm1031_vm2, %v2362_v0  ;;  %v2410_v48 = vld [vmem:[%s2616_s17 + $0x198] sm:$0xff]  }
  0x4e   : > { %2217 = vmatprep.mubr.msk.bf16.mxu0 %vm1031_vm2, %v2363_v1  ;;  %2269 = vmatprep.mubr.msk.bf16.mxu1 %vm1031_vm2, %v2364_v2 }
  0x55   : > { %2218 = vmatmul.mubr.msk.bf16.gmra.mrb[4].mxu0 %vm1031_vm2, %v2365_v3  ;;  %2270 = vmatmul.mubr.msk.bf16.gmra.mrb[4].mxu1 %vm1031_vm2, %v2366_v4 }
  0x56   : > { %2221 = vmatprep.mubr.msk.bf16.mxu0 %vm1031_vm2, %v2367_v5  ;;  %2273 = vmatprep.mubr.msk.bf16.mxu1 %vm1031_vm2, %v2368_v6 }
  0x5d   : > { %2222 = vmatmul.mubr.msk.bf16.gmra.mrb[8].mxu0 %vm1031_vm2, %v2369_v7  ;;  %2274 = vmatmul.mubr.msk.bf16.gmra.mrb[8].mxu1 %vm1031_vm2, %v2370_v8 }
  0x5e   : > { %2225 = vmatprep.mubr.msk.bf16.mxu0 %vm1031_vm2, %v2371_v9  ;;  %2277 = vmatprep.mubr.msk.bf16.mxu1 %vm1031_vm2, %v2372_v10 }
  0x65   : > { %2226 = vmatmul.mubr.msk.bf16.gmra.mrb[12].mxu0 %vm1031_vm2, %v2373_v11  ;;  %2278 = vmatmul.mubr.msk.bf16.gmra.mrb[12].mxu1 %vm1031_vm2, %v2374_v12 }
  0x66   : > { %2229 = vmatprep.mubr.msk.bf16.mxu0 %vm1031_vm2, %v2375_v13  ;;  %2281 = vmatprep.mubr.msk.bf16.mxu1 %vm1031_vm2, %v2376_v14 }
  0x6d   : > { %2230 = vmatmul.mubr.msk.bf16.gmra.mrb[16].mxu0 %vm1031_vm2, %v2377_v15  ;;  %2282 = vmatmul.mubr.msk.bf16.gmra.mrb[16].mxu1 %vm1031_vm2, %v2378_v16 }
  0x6e   : > { %2233 = vmatprep.mubr.msk.bf16.mxu0 %vm1031_vm2, %v2379_v17  ;;  %2285 = vmatprep.mubr.msk.bf16.mxu1 %vm1031_vm2, %v2380_v18 }
  0x75   : > { %2234 = vmatmul.mubr.msk.bf16.gmra.mrb[20].mxu0 %vm1031_vm2, %v2381_v19  ;;  %2286 = vmatmul.mubr.msk.bf16.gmra.mrb[20].mxu1 %vm1031_vm2, %v2382_v20 }
  0x76   : > { %2237 = vmatprep.mubr.msk.bf16.mxu0 %vm1031_vm2, %v2383_v21  ;;  %2289 = vmatprep.mubr.msk.bf16.mxu1 %vm1031_vm2, %v2384_v22 }
  0x7d   : > { %2238 = vmatmul.mubr.msk.bf16.gmra.mrb[24].mxu0 %vm1031_vm2, %v2385_v23  ;;  %2290 = vmatmul.mubr.msk.bf16.gmra.mrb[24].mxu1 %vm1031_vm2, %v2386_v24 }
  0x7e   : > { %2241 = vmatprep.mubr.msk.bf16.mxu0 %vm1031_vm2, %v2387_v25  ;;  %2293 = vmatprep.mubr.msk.bf16.mxu1 %vm1031_vm2, %v2388_v26 }
  0x85   : > { %2242 = vmatmul.mubr.msk.bf16.gmra.mrb[28].mxu0 %vm1031_vm2, %v2389_v27  ;;  %2294 = vmatmul.mubr.msk.bf16.gmra.mrb[28].mxu1 %vm1031_vm2, %v2390_v28 }
  0x86   : > { %2245 = vmatprep.mubr.msk.bf16.mxu0 %vm1031_vm2, %v2391_v29  ;;  %2297 = vmatprep.mubr.msk.bf16.mxu1 %vm1031_vm2, %v2392_v30 }
  0x8d   : > { %2246 = vmatmul.mubr.msk.bf16.gmra.mrb[32].mxu0 %vm1031_vm2, %v2393_v31  ;;  %2298 = vmatmul.mubr.msk.bf16.gmra.mrb[32].mxu1 %vm1031_vm2, %v2394_v32 }
  0x8e   : > { %2249 = vmatprep.mubr.msk.bf16.mxu0 %vm1031_vm2, %v2395_v33  ;;  %2301 = vmatprep.mubr.msk.bf16.mxu1 %vm1031_vm2, %v2396_v34 }
  0x95   : > { %2250 = vmatmul.mubr.msk.bf16.gmra.mrb[36].mxu0 %vm1031_vm2, %v2397_v35  ;;  %2302 = vmatmul.mubr.msk.bf16.gmra.mrb[36].mxu1 %vm1031_vm2, %v2398_v36 }
  0x96   : > { %2253 = vmatprep.mubr.msk.bf16.mxu0 %vm1031_vm2, %v2399_v37  ;;  %2305 = vmatprep.mubr.msk.bf16.mxu1 %vm1031_vm2, %v2400_v38 }
  0x9d   : > { %2254 = vmatmul.mubr.msk.bf16.gmra.mrb[40].mxu0 %vm1031_vm2, %v2401_v39  ;;  %2306 = vmatmul.mubr.msk.bf16.gmra.mrb[40].mxu1 %vm1031_vm2, %v2402_v40  ;;  %v2819_v39 = vld [vmem:[%s2968_s2] ss:$0 sm:$0xff] }
  0x9e   : > { %2257 = vmatprep.mubr.msk.bf16.mxu0 %vm1031_vm2, %v2403_v41  ;;  %2309 = vmatprep.mubr.msk.bf16.mxu1 %vm1031_vm2, %v2404_v42 }
  0xa5   : > { %2258 = vmatmul.mubr.msk.bf16.gmra.mrb[44].mxu0 %vm1031_vm2, %v2405_v43  ;;  %2310 = vmatmul.mubr.msk.bf16.gmra.mrb[44].mxu1 %vm1031_vm2, %v2406_v44 }
  0xa6   : > { %2261 = vmatprep.mubr.msk.bf16.mxu0 %vm1031_vm2, %v2407_v45  ;;  %2313 = vmatprep.mubr.msk.bf16.mxu1 %vm1031_vm2, %v2408_v46 }
  0xad   : > { %2262 = vmatmul.mubr.msk.bf16.gmra.mrb[48].mxu0 %vm1031_vm2, %v2409_v47  ;;  %2314 = vmatmul.mubr.msk.bf16.gmra.mrb[48].mxu1 %vm1031_vm2, %v2410_v48 }
 0x120   : > { %v2722_v49 = vpop.f32.mrb[0].mxu0  ;;  %v2724_v50 = vpop.f32.mrb[0].mxu1 }
 0x121   : > { %v1229_v51 = vpop.f32.mrb[1].mxu0  ;;  %v1437_v52 = vpop.f32.mrb[1].mxu1 }
 0x122   : > { %v2726_v53 = vpop.f32.mrb[2].mxu0  ;;  %v2728_v54 = vpop.f32.mrb[2].mxu1 }
 0x123   : > { %v1232_v55 = vpop.f32.mrb[3].mxu0  ;;  %v1440_v56 = vpop.f32.mrb[3].mxu1 }
 0x128   : > { %v2730_v57 = vpop.f32.mrb[4].mxu0  ;;  %v2732_v58 = vpop.f32.mrb[4].mxu1 }
 0x129   : > { %v2734_v59 = vpop.f32.mrb[5].mxu0  ;;  %v2736_v60 = vpop.f32.mrb[5].mxu1 }
 0x12a   : > { %v2738_v61 = vpop.f32.mrb[6].mxu0  ;;  %v2740_v62 = vpop.f32.mrb[6].mxu1 }
 0x12b   : > { %v2742_v63 = vpop.f32.mrb[7].mxu0  ;;  %v2744_v0 = vpop.f32.mrb[7].mxu1 }
 0x130   : > { %v2746_v1 = vpop.f32.mrb[8].mxu0  ;;  %v2748_v2 = vpop.f32.mrb[8].mxu1 }
 0x131   : > { %v2750_v3 = vpop.f32.mrb[9].mxu0  ;;  %v2752_v4 = vpop.f32.mrb[9].mxu1 }
 0x132   : > { %v2754_v5 = vpop.f32.mrb[10].mxu0  ;;  %v2756_v6 = vpop.f32.mrb[10].mxu1 }
 0x133   : > { %v2758_v7 = vpop.f32.mrb[11].mxu0  ;;  %v2760_v8 = vpop.f32.mrb[11].mxu1 }
 0x138   : > { %v2762_v9 = vpop.f32.mrb[12].mxu0  ;;  %v2764_v10 = vpop.f32.mrb[12].mxu1 }
 0x139   : > { %v2766_v11 = vpop.f32.mrb[13].mxu0  ;;  %v2768_v12 = vpop.f32.mrb[13].mxu1 }
 0x13a   : > { %v2770_v13 = vpop.f32.mrb[14].mxu0  ;;  %v2772_v14 = vpop.f32.mrb[14].mxu1 }
 0x13b   : > { %v2774_v15 = vpop.f32.mrb[15].mxu0  ;;  %v2776_v16 = vpop.f32.mrb[15].mxu1 }
 0x140   : > { %v2778_v17 = vpop.f32.mrb[16].mxu0  ;;  %v2780_v18 = vpop.f32.mrb[16].mxu1 }
 0x141   : > { %v2782_v19 = vpop.f32.mrb[17].mxu0  ;;  %v2784_v20 = vpop.f32.mrb[17].mxu1 }
 0x142   : > { %v2786_v21 = vpop.f32.mrb[18].mxu0  ;;  %v2788_v22 = vpop.f32.mrb[18].mxu1 }
 0x143   : > { %v2790_v23 = vpop.f32.mrb[19].mxu0  ;;  %v2792_v24 = vpop.f32.mrb[19].mxu1 }
 0x148   : > { %v2794_v25 = vpop.f32.mrb[20].mxu0  ;;  %v2796_v26 = vpop.f32.mrb[20].mxu1 }
 0x149   : > { %v2798_v27 = vpop.f32.mrb[21].mxu0  ;;  %v2800_v28 = vpop.f32.mrb[21].mxu1 }
 0x14a   : > { %v2804_v29 = vpop.f32.mrb[22].mxu0  ;;  %v2806_v30 = vpop.f32.mrb[22].mxu1 }
 0x14b   : > { %2970 = vst [vmem:[#allocation3_spill] sm:$0xff] %v2804_v29  ;;  %2971 = vst [vmem:[#allocation4_spill] sm:$0xff] %v2806_v30  ;;  %v2808_v31 = vpop.f32.mrb[23].mxu0  ;;  %v2810_v32 = vpop.f32.mrb[23].mxu1 }
 0x150   : > { %v2239_v33 = vpop.f32.mrb[24].mxu0  ;;  %v2291_v34 = vpop.f32.mrb[24].mxu1 }
 0x151   : > { %v1644_v35 = vmax.f32 %v1229_v51, %v2239_v33  ;;  %v1670_v36 = vmax.f32 %v1437_v52, %v2291_v34  ;;  %v2812_v37 = vpop.f32.mrb[25].mxu0  ;;  %v2814_v38 = vpop.f32.mrb[25].mxu1 }
 0x152   : > { %v2240_v40 = vpop.f32.mrb[26].mxu0  ;;  %v2292_v41 = vpop.f32.mrb[26].mxu1 }
 0x153   : > { %v1696_v42 = vmax.f32 %v1644_v35, %v1670_v36  ;;  %v1645_v43 = vmax.f32 %v1232_v55, %v2240_v40  ;;  %v1671_v44 = vmax.f32 %v1440_v56, %v2292_v41  ;;  %v2821_v45 = vpop.f32.mrb[27].mxu0  ;;  %v2823_v46 = vpop.f32.mrb[27].mxu1 }
 0x155   : > { %v1729_v47 = vadd.f32 %v2819_v39, %v1696_v42  ;;  %v1697_v48 = vmax.f32 %v1645_v43, %v1671_v44 }
 0x157   : > { %v1755_v51 = vmax.f32 %v1729_v47, 0.0  ;;  %v1730_v52 = vadd.f32 %v2819_v39, %v1697_v48 }
 0x158   : > { %v2243_v55 = vpop.f32.mrb[28].mxu0  ;;  %v2295_v56 = vpop.f32.mrb[28].mxu1 }
 0x159   : > { %v2120_v33 = vpack.c.bf16 %v1755_v51, %v1755_v51  ;;  %v1756_v34 = vmax.f32 %v1730_v52, 0.0  ;;  %v1648_v35 = vmax.f32 %v2734_v59, %v2243_v55  ;;  %v1674_v36 = vmax.f32 %v2736_v60, %v2295_v56  ;;  %v1341_v40 = vpop.f32.mrb[29].mxu0  ;;  %v1549_v41 = vpop.f32.mrb[29].mxu1 }
 0x15a   : > { %v1646_v42 = vmax.f32 %v2722_v49, %v1341_v40  ;;  %v1672_v43 = vmax.f32 %v2724_v50, %v1549_v41  ;;  %v2244_v44 = vpop.f32.mrb[30].mxu0  ;;  %v2296_v47 = vpop.f32.mrb[30].mxu1 }
 0x15b   : > { %1886 = vst.msk [vmem:[%s2830_s22] sm:$0xf] %vm1885_vm3, %v2120_v33  ;;  %v2121_v48 = vpack.c.bf16 %v1756_v34, %v1756_v34  ;;  %v1700_v30 = vmax.f32 %v1648_v35, %v1674_v36  ;;  %v1649_v51 = vmax.f32 %v2742_v63, %v2244_v44  ;;  %v1675_v52 = vmax.f32 %v2744_v0, %v2296_v47  ;;  %v1344_v59 = vpop.f32.mrb[31].mxu0  ;;  %v1552_v55 = vpop.f32.mrb[31].mxu1 }
 0x15c   : > { %v1698_v60 = vmax.f32 %v1646_v42, %v1672_v43  ;;  %v1647_v56 = vmax.f32 %v2726_v53, %v1344_v59  ;;  %v1673_v29 = vmax.f32 %v2728_v54, %v1552_v55 }
 0x15d   : > { %1887 = vst.msk [vmem:[%s2830_s22 + $0x4] sm:$0xf] %vm1885_vm3, %v2121_v48  ;;  %v1733_v49 = vadd.f32 %v2819_v39, %v1700_v30  ;;  %v1701_v50 = vmax.f32 %v1649_v51, %v1675_v52 }
 0x15e   : > { %v1731_v33 = vadd.f32 %v2819_v39, %v1698_v60  ;;  %v1699_v34 = vmax.f32 %v1647_v56, %v1673_v29 }
 0x15f   : > { %v1759_v35 = vmax.f32 %v1733_v49, 0.0  ;;  %v1734_v63 = vadd.f32 %v2819_v39, %v1701_v50 }
 0x160   : > { %v1757_v36 = vmax.f32 %v1731_v33, 0.0  ;;  %v1732_v0 = vadd.f32 %v2819_v39, %v1699_v34  ;;  %v2247_v40 = vpop.f32.mrb[32].mxu0  ;;  %v2299_v41 = vpop.f32.mrb[32].mxu1 }
 0x161   : > { %v2124_v53 = vpack.c.bf16 %v1759_v35, %v1759_v35  ;;  %v1760_v42 = vmax.f32 %v1734_v63, 0.0  ;;  %v1652_v54 = vmax.f32 %v2750_v3, %v2247_v40  ;;  %v1678_v43 = vmax.f32 %v2752_v4, %v2299_v41  ;;  %v1357_v30 = vpop.f32.mrb[33].mxu0  ;;  %v1565_v44 = vpop.f32.mrb[33].mxu1 }
 0x162   : > { %v2122_v47 = vpack.c.bf16 %v1757_v36, %v1757_v36  ;;  %v1758_v29 = vmax.f32 %v1732_v0, 0.0  ;;  %v1650_v48 = vmax.f32 %v2730_v57, %v1357_v30  ;;  %v1676_v51 = vmax.f32 %v2732_v58, %v1565_v44  ;;  %v2248_v52 = vpop.f32.mrb[34].mxu0  ;;  %v2300_v59 = vpop.f32.mrb[34].mxu1 }
 0x163   : > { %1890 = vst.msk [vmem:[%s2830_s22 + $0x10] sm:$0xf] %vm1885_vm3, %v2124_v53  ;;  %v2125_v55 = vpack.c.bf16 %v1760_v42, %v1760_v42  ;;  %v1704_v60 = vmax.f32 %v1652_v54, %v1678_v43  ;;  %v1653_v3 = vmax.f32 %v2758_v7, %v2248_v52  ;;  %v1679_v4 = vmax.f32 %v2760_v8, %v2300_v59  ;;  %v1360_v56 = vpop.f32.mrb[35].mxu0  ;;  %v1568_v49 = vpop.f32.mrb[35].mxu1 }
 0x164   : > { %1888 = vst.msk [vmem:[%s2830_s22 + $0x8] sm:$0xf] %vm1885_vm3, %v2122_v47  ;;  %v2123_v50 = vpack.c.bf16 %v1758_v29, %v1758_v29  ;;  %v1702_v57 = vmax.f32 %v1650_v48, %v1676_v51  ;;  %v1651_v33 = vmax.f32 %v2738_v61, %v1360_v56  ;;  %v1677_v58 = vmax.f32 %v2740_v62, %v1568_v49 }
 0x165   : > { %1891 = vst.msk [vmem:[%s2830_s22 + $0x14] sm:$0xf] %vm1885_vm3, %v2125_v55  ;;  %v1737_v34 = vadd.f32 %v2819_v39, %v1704_v60  ;;  %v1705_v35 = vmax.f32 %v1653_v3, %v1679_v4 }
 0x166   : > { %1889 = vst.msk [vmem:[%s2830_s22 + $0xc] sm:$0xf] %vm1885_vm3, %v2123_v50  ;;  %v1735_v7 = vadd.f32 %v2819_v39, %v1702_v57  ;;  %v1703_v8 = vmax.f32 %v1651_v33, %v1677_v58 }
 0x167   : > { %v1763_v63 = vmax.f32 %v1737_v34, 0.0  ;;  %v1738_v36 = vadd.f32 %v2819_v39, %v1705_v35 }
 0x168   : > { %v1761_v0 = vmax.f32 %v1735_v7, 0.0  ;;  %v1736_v40 = vadd.f32 %v2819_v39, %v1703_v8  ;;  %v2251_v61 = vpop.f32.mrb[36].mxu0  ;;  %v2303_v41 = vpop.f32.mrb[36].mxu1 }
 0x169   : > { %v2128_v62 = vpack.c.bf16 %v1763_v63, %v1763_v63  ;;  %v1764_v53 = vmax.f32 %v1738_v36, 0.0  ;;  %v1656_v42 = vmax.f32 %v2766_v11, %v2251_v61  ;;  %v1682_v54 = vmax.f32 %v2768_v12, %v2303_v41  ;;  %v1373_v43 = vpop.f32.mrb[37].mxu0  ;;  %v1581_v30 = vpop.f32.mrb[37].mxu1 }
 0x16a   : > { %v2126_v44 = vpack.c.bf16 %v1761_v0, %v1761_v0  ;;  %v1762_v47 = vmax.f32 %v1736_v40, 0.0  ;;  %v1654_v29 = vmax.f32 %v2746_v1, %v1373_v43  ;;  %v1680_v48 = vmax.f32 %v2748_v2, %v1581_v30  ;;  %v2252_v51 = vpop.f32.mrb[38].mxu0  ;;  %v2304_v52 = vpop.f32.mrb[38].mxu1 }
 0x16b   : > { %1894 = vst.msk [vmem:[%s2830_s22 + $0x20] sm:$0xf] %vm1885_vm3, %v2128_v62  ;;  %v2129_v59 = vpack.c.bf16 %v1764_v53, %v1764_v53  ;;  %v1708_v55 = vmax.f32 %v1656_v42, %v1682_v54  ;;  %v1657_v11 = vmax.f32 %v2774_v15, %v2252_v51  ;;  %v1683_v12 = vmax.f32 %v2776_v16, %v2304_v52  ;;  %v1376_v60 = vpop.f32.mrb[39].mxu0  ;;  %v1584_v3 = vpop.f32.mrb[39].mxu1 }
 0x16c   : > { %1892 = vst.msk [vmem:[%s2830_s22 + $0x18] sm:$0xf] %vm1885_vm3, %v2126_v44  ;;  %v2127_v4 = vpack.c.bf16 %v1762_v47, %v1762_v47  ;;  %v1706_v1 = vmax.f32 %v1654_v29, %v1680_v48  ;;  %v1655_v56 = vmax.f32 %v2754_v5, %v1376_v60  ;;  %v1681_v2 = vmax.f32 %v2756_v6, %v1584_v3 }
 0x16d   : > { %1895 = vst.msk [vmem:[%s2830_s22 + $0x24] sm:$0xf] %vm1885_vm3, %v2129_v59  ;;  %v1741_v49 = vadd.f32 %v2819_v39, %v1708_v55  ;;  %v1709_v50 = vmax.f32 %v1657_v11, %v1683_v12 }
 0x16e   : > { %1893 = vst.msk [vmem:[%s2830_s22 + $0x1c] sm:$0xf] %vm1885_vm3, %v2127_v4  ;;  %v1739_v15 = vadd.f32 %v2819_v39, %v1706_v1  ;;  %v1707_v16 = vmax.f32 %v1655_v56, %v1681_v2 }
 0x16f   : > { %v1767_v57 = vmax.f32 %v1741_v49, 0.0  ;;  %v1742_v33 = vadd.f32 %v2819_v39, %v1709_v50 }
 0x170   : > { %v1765_v58 = vmax.f32 %v1739_v15, 0.0  ;;  %v1740_v34 = vadd.f32 %v2819_v39, %v1707_v16  ;;  %v2255_v5 = vpop.f32.mrb[40].mxu0  ;;  %v2307_v35 = vpop.f32.mrb[40].mxu1 }
 0x171   : > { %v2132_v6 = vpack.c.bf16 %v1767_v57, %v1767_v57  ;;  %v1768_v7 = vmax.f32 %v1742_v33, 0.0  ;;  %v1660_v8 = vmax.f32 %v2782_v19, %v2255_v5  ;;  %v1686_v63 = vmax.f32 %v2784_v20, %v2307_v35  ;;  %v1389_v36 = vpop.f32.mrb[41].mxu0  ;;  %v1597_v0 = vpop.f32.mrb[41].mxu1 }
 0x172   : > { %v2130_v40 = vpack.c.bf16 %v1765_v58, %v1765_v58  ;;  %v1766_v61 = vmax.f32 %v1740_v34, 0.0  ;;  %v1658_v41 = vmax.f32 %v2762_v9, %v1389_v36  ;;  %v1684_v62 = vmax.f32 %v2764_v10, %v1597_v0  ;;  %v2256_v53 = vpop.f32.mrb[42].mxu0  ;;  %v2308_v42 = vpop.f32.mrb[42].mxu1 }
 0x173   : > { %1898 = vst.msk [vmem:[%s2830_s22 + $0x30] sm:$0xf] %vm1885_vm3, %v2132_v6  ;;  %v2133_v54 = vpack.c.bf16 %v1768_v7, %v1768_v7  ;;  %v1712_v43 = vmax.f32 %v1660_v8, %v1686_v63  ;;  %v1661_v19 = vmax.f32 %v2790_v23, %v2256_v53  ;;  %v1687_v20 = vmax.f32 %v2792_v24, %v2308_v42  ;;  %v1392_v30 = vpop.f32.mrb[43].mxu0  ;;  %v1600_v44 = vpop.f32.mrb[43].mxu1 }
 0x174   : > { %1896 = vst.msk [vmem:[%s2830_s22 + $0x28] sm:$0xf] %vm1885_vm3, %v2130_v40  ;;  %v2131_v47 = vpack.c.bf16 %v1766_v61, %v1766_v61  ;;  %v1710_v9 = vmax.f32 %v1658_v41, %v1684_v62  ;;  %v1659_v29 = vmax.f32 %v2770_v13, %v1392_v30  ;;  %v1685_v10 = vmax.f32 %v2772_v14, %v1600_v44 }
 0x175   : > { %1899 = vst.msk [vmem:[%s2830_s22 + $0x34] sm:$0xf] %vm1885_vm3, %v2133_v54  ;;  %v1745_v48 = vadd.f32 %v2819_v39, %v1712_v43  ;;  %v1713_v51 = vmax.f32 %v1661_v19, %v1687_v20 }
 0x176   : > { %1897 = vst.msk [vmem:[%s2830_s22 + $0x2c] sm:$0xf] %vm1885_vm3, %v2131_v47  ;;  %v1743_v23 = vadd.f32 %v2819_v39, %v1710_v9  ;;  %v1711_v24 = vmax.f32 %v1659_v29, %v1685_v10 }
 0x177   : > { %v1771_v52 = vmax.f32 %v1745_v48, 0.0  ;;  %v1746_v59 = vadd.f32 %v2819_v39, %v1713_v51 }
 0x178   : > { %v1769_v55 = vmax.f32 %v1743_v23, 0.0  ;;  %v1744_v11 = vadd.f32 %v2819_v39, %v1711_v24  ;;  %v2259_v13 = vpop.f32.mrb[44].mxu0  ;;  %v2311_v12 = vpop.f32.mrb[44].mxu1  ;;  %v2972_v23 = vld [vmem:[#allocation3_spill] sm:$0xff] }
 0x179   : > { %v2136_v14 = vpack.c.bf16 %v1771_v52, %v1771_v52  ;;  %v1772_v60 = vmax.f32 %v1746_v59, 0.0  ;;  %v1664_v3 = vmax.f32 %v2798_v27, %v2259_v13  ;;  %v1690_v4 = vmax.f32 %v2800_v28, %v2311_v12  ;;  %v1405_v1 = vpop.f32.mrb[45].mxu0  ;;  %v1613_v56 = vpop.f32.mrb[45].mxu1 }
 0x17a   : > { %v2134_v2 = vpack.c.bf16 %v1769_v55, %v1769_v55  ;;  %v1770_v49 = vmax.f32 %v1744_v11, 0.0  ;;  %v1662_v50 = vmax.f32 %v2778_v17, %v1405_v1  ;;  %v1688_v15 = vmax.f32 %v2780_v18, %v1613_v56  ;;  %v2260_v16 = vpop.f32.mrb[46].mxu0  ;;  %v2312_v57 = vpop.f32.mrb[46].mxu1 }
 0x17b   : > { %1902 = vst.msk [vmem:[%s2830_s22 + $0x40] sm:$0xf] %vm1885_vm3, %v2136_v14  ;;  %v2137_v33 = vpack.c.bf16 %v1772_v60, %v1772_v60  ;;  %v1716_v58 = vmax.f32 %v1664_v3, %v1690_v4  ;;  %v1665_v27 = vmax.f32 %v2808_v31, %v2260_v16  ;;  %v1691_v28 = vmax.f32 %v2810_v32, %v2312_v57  ;;  %v1408_v34 = vpop.f32.mrb[47].mxu0  ;;  %v1616_v5 = vpop.f32.mrb[47].mxu1 }
 0x17c   : > { %1900 = vst.msk [vmem:[%s2830_s22 + $0x38] sm:$0xf] %vm1885_vm3, %v2134_v2  ;;  %v2135_v35 = vpack.c.bf16 %v1770_v49, %v1770_v49  ;;  %v1714_v17 = vmax.f32 %v1662_v50, %v1688_v15  ;;  %v1663_v6 = vmax.f32 %v2786_v21, %v1408_v34  ;;  %v1689_v18 = vmax.f32 %v2788_v22, %v1616_v5 }
 0x17d   : > { %1903 = vst.msk [vmem:[%s2830_s22 + $0x44] sm:$0xf] %vm1885_vm3, %v2137_v33  ;;  %v1749_v7 = vadd.f32 %v2819_v39, %v1716_v58  ;;  %v1717_v8 = vmax.f32 %v1665_v27, %v1691_v28 }
 0x17e   : > { %1901 = vst.msk [vmem:[%s2830_s22 + $0x3c] sm:$0xf] %vm1885_vm3, %v2135_v35  ;;  %v1747_v31 = vadd.f32 %v2819_v39, %v1714_v17  ;;  %v1715_v32 = vmax.f32 %v1663_v6, %v1689_v18 }
 0x17f   : > { %v1775_v63 = vmax.f32 %v1749_v7, 0.0  ;;  %v1750_v36 = vadd.f32 %v2819_v39, %v1717_v8 }
 0x180   : > { %v1773_v0 = vmax.f32 %v1747_v31, 0.0  ;;  %v1748_v40 = vadd.f32 %v2819_v39, %v1715_v32  ;;  %v2263_v21 = vpop.f32.mrb[48].mxu0  ;;  %v2315_v61 = vpop.f32.mrb[48].mxu1 }
 0x181   : > { %v2140_v22 = vpack.c.bf16 %v1775_v63, %v1775_v63  ;;  %v1776_v41 = vmax.f32 %v1750_v36, 0.0  ;;  %v1668_v62 = vmax.f32 %v2812_v37, %v2263_v21  ;;  %v1694_v53 = vmax.f32 %v2814_v38, %v2315_v61  ;;  %v1421_v42 = vpop.f32.mrb[49].mxu0  ;;  %v1629_v54 = vpop.f32.mrb[49].mxu1 }
 0x182   : > { %v2138_v43 = vpack.c.bf16 %v1773_v0, %v1773_v0  ;;  %v1774_v19 = vmax.f32 %v1748_v40, 0.0  ;;  %v1666_v20 = vmax.f32 %v2794_v25, %v1421_v42  ;;  %v1692_v30 = vmax.f32 %v2796_v26, %v1629_v54  ;;  %v2264_v44 = vpop.f32.mrb[50].mxu0  ;;  %v2316_v47 = vpop.f32.mrb[50].mxu1  ;;  %v2973_v26 = vld [vmem:[#allocation4_spill] sm:$0xff] }
 0x183   : > { %1906 = vst.msk [vmem:[%s2830_s22 + $0x50] sm:$0xf] %vm1885_vm3, %v2140_v22  ;;  %v2141_v9 = vpack.c.bf16 %v1776_v41, %v1776_v41  ;;  %v1720_v29 = vmax.f32 %v1668_v62, %v1694_v53  ;;  %v1669_v37 = vmax.f32 %v2821_v45, %v2264_v44  ;;  %v1695_v38 = vmax.f32 %v2823_v46, %v2316_v47  ;;  %v1424_v10 = vpop.f32.mrb[51].mxu0  ;;  %v1632_v48 = vpop.f32.mrb[51].mxu1 }
 0x184   : > { %1904 = vst.msk [vmem:[%s2830_s22 + $0x48] sm:$0xf] %vm1885_vm3, %v2138_v43  ;;  %v2139_v51 = vpack.c.bf16 %v1774_v19, %v1774_v19  ;;  %v1718_v25 = vmax.f32 %v1666_v20, %v1692_v30  ;;  %v1667_v24 = vmax.f32 %v2972_v23, %v1424_v10  ;;  %v1693_v52 = vmax.f32 %v2973_v26, %v1632_v48 }
 0x185   : > { %1907 = vst.msk [vmem:[%s2830_s22 + $0x54] sm:$0xf] %vm1885_vm3, %v2141_v9  ;;  %v1753_v59 = vadd.f32 %v2819_v39, %v1720_v29  ;;  %v1721_v55 = vmax.f32 %v1669_v37, %v1695_v38 }
 0x186   : > { %1905 = vst.msk [vmem:[%s2830_s22 + $0x4c] sm:$0xf] %vm1885_vm3, %v2139_v51  ;;  %v1751_v45 = vadd.f32 %v2819_v39, %v1718_v25  ;;  %v1719_v46 = vmax.f32 %v1667_v24, %v1693_v52 }
 0x187   : > { %v1779_v11 = vmax.f32 %v1753_v59, 0.0  ;;  %v1754_v13 = vadd.f32 %v2819_v39, %v1721_v55 }
 0x188   : > { %v1777_v12 = vmax.f32 %v1751_v45, 0.0  ;;  %v1752_v14 = vadd.f32 %v2819_v39, %v1719_v46 }
 0x189   : > { %v2144_v60 = vpack.c.bf16 %v1779_v11, %v1779_v11  ;;  %v1780_v3 = vmax.f32 %v1754_v13, 0.0 }
 0x18a   : > { %v2142_v4 = vpack.c.bf16 %v1777_v12, %v1777_v12  ;;  %v1778_v1 = vmax.f32 %v1752_v14, 0.0 }
 0x18b   : > { %1910 = vst.msk [vmem:[%s2830_s22 + $0x60] sm:$0xf] %vm1885_vm3, %v2144_v60  ;;  %v2145_v56 = vpack.c.bf16 %v1780_v3, %v1780_v3 }
 0x18c   : > { %1908 = vst.msk [vmem:[%s2830_s22 + $0x58] sm:$0xf] %vm1885_vm3, %v2142_v4  ;;  %v2143_v2 = vpack.c.bf16 %v1778_v1, %v1778_v1 }
 0x18d   : > { %1911 = vst.msk [vmem:[%s2830_s22 + $0x64] sm:$0xf] %vm1885_vm3, %v2145_v56 }
 0x18e   : > { %1909 = vst.msk [vmem:[%s2830_s22 + $0x5c] sm:$0xf] %vm1885_vm3, %v2143_v2 }
 0x18f PF: > { %p10_p9 = scmp.ge.s32.totalorder %s2473_s16, 4   ;;  %s2974_s12 = smov %s2429_s13 }
 0x190   : > { %s2975_s13 = smov %s2482_s19  ;;  %s2976_s14 = smov %s2473_s16 }
 0x191   :  { %12 = sbr.rel (!%p10_p9) target bundleno = 2 (0x2), region = 108 }

// kernel: cnn_forward.4
= control target key start
LH: loop header
LB: loop body
LE: loop exit
PB: predicated region body
PF: predicated region fallthrough
CT: control target
= control target key end

     0   :  { %s1277_s12 = smov 0   ;;  %s1279_s13 = smov 0   ;;  %s1553_s0 = inlined_call_operand.vmem [shape: bf16[4,64,400], index: 0, kind: input, shape index: {}]   ;;  %s1554_s1 = inlined_call_operand.vmem [shape: bf16[400,128], index: 1, kind: input, shape index: {}]   ;;  %s1555_s2 = inlined_call_operand.vmem [shape: f32[1,128], index: 2, kind: input, shape index: {}]   ;;  %s1556_s3 = inlined_call_operand.vmem [shape: bf16[64,128], index: 3, kind: output, shape index: {}]  }
   0x1   :  { %s1281_s14 = smov 0  }
   0x2 LB: > { %s969_s15 = sadd.s32 4294967295, %s1254_s14   ;;  %s1294_s16 = sadd.s32 1, %s1254_s14   ;;  %s1254_s14 = sphi %s1281_s14, %s1559_s14   ;;  %s1250_s13 = sphi %s1279_s13, %s1558_s13   ;;  %s1246_s12 = sphi %s1277_s12, %s1557_s12  }
   0x3   : > { %s17_s17 = ssub.s32 %s1254_s14, %s1294_s16  ;;  %s20_s18 = sadd.s32 1, %s1250_s13 }
   0x4   : > { %p18_p0 = scmp.eq.s32.totalorder %s17_s17, 0  ;;  %p27_p1 = scmp.ne.s32.totalorder %s1250_s13, %s1246_s12 }
   0x5   : > { %p28_p2 = scmp.eq.s32.totalorder %s1254_s14, 0  ;;  %p972_p4 = scmp.ge.s32.totalorder %s1254_s14, 2 }
   0x6   : > { %s1303_s19 = scalar_select %p18_p0, %s1250_s13, %s20_s18  }
   0x7   : > { %p29_p3 = por %p28_p2, %p27_p1  ;;  %127 = sbr.rel (%p972_p4) target bundleno = 34 (0x22), region = 24 }
   0xe   : > { %130 = sbr.rel (!%p29_p3) target bundleno = 34 (0x22), region = 28  ;;  %s132_s20 = sand.u32 (%p29_p3), 1, %s1250_s13  }
   0xf   : > { %s1054_s21 = sshll.u32 (%p29_p3), %s1254_s14, 6  ;;  %s973_s22 = sshll.u32 (%p29_p3), %s132_s20, 8 }
  0x10   : > { %s1311_s25 = scalar_lea.vmem (%p29_p3), %s1553_s0, %s1054_s21  ;;  %s1316_s26 = scalar_lea.vmem (%p29_p3), [#allocation2], %s973_s22 }
  0x11   : > { %v151_v0 = vld [vmem:[%s1311_s25] sm:$0xff] (%p29_p3)  ;;  %v153_v1 = vld [vmem:[%s1311_s25 + $0x8] sm:$0xff] (%p29_p3)  ;;  %v155_v2 = vld [vmem:[%s1311_s25 + $0x10] sm:$0xff] (%p29_p3) }
  0x12   : > { %152 = vst [vmem:[%s1316_s26] sm:$0xff] (%p29_p3), %v151_v0  ;;  %154 = vst [vmem:[%s1316_s26 + $0x8] sm:$0xff] (%p29_p3), %v153_v1  ;;  %v157_v3 = vld [vmem:[%s1311_s25 + $0x18] sm:$0xff] (%p29_p3)  ;;  %v159_v4 = vld [vmem:[%s1311_s25 + $0x20] sm:$0xff] (%p29_p3) }
  0x13   : > { %156 = vst [vmem:[%s1316_s26 + $0x10] sm:$0xff] (%p29_p3), %v155_v2  ;;  %v161_v5 = vld [vmem:[%s1311_s25 + $0x28] sm:$0xff] (%p29_p3)  ;;  %158 = vst [vmem:[%s1316_s26 + $0x18] sm:$0xff] (%p29_p3), %v157_v3  ;;  %v163_v6 = vld [vmem:[%s1311_s25 + $0x30] sm:$0xff] (%p29_p3) }
  0x14   : > { %160 = vst [vmem:[%s1316_s26 + $0x20] sm:$0xff] (%p29_p3), %v159_v4  ;;  %162 = vst [vmem:[%s1316_s26 + $0x28] sm:$0xff] (%p29_p3), %v161_v5  ;;  %v165_v7 = vld [vmem:[%s1311_s25 + $0x38] sm:$0xff] (%p29_p3)  ;;  %v167_v8 = vld [vmem:[%s1311_s25 + $0x80] sm:$0xff] (%p29_p3) }
  0x15   : > { %164 = vst [vmem:[%s1316_s26 + $0x30] sm:$0xff] %v163_v6  ;;  %166 = vst [vmem:[%s1316_s26 + $0x38] sm:$0xff] %v165_v7  ;;  %v169_v9 = vld [vmem:[%s1311_s25 + $0x88] sm:$0xff]  ;;  %v171_v10 = vld [vmem:[%s1311_s25 + $0x90] sm:$0xff] }
  0x16   : > { %168 = vst [vmem:[%s1316_s26 + $0x40] sm:$0xff] %v167_v8  ;;  %v173_v11 = vld [vmem:[%s1311_s25 + $0x98] sm:$0xff]  ;;  %170 = vst [vmem:[%s1316_s26 + $0x48] sm:$0xff] %v169_v9  ;;  %v175_v12 = vld [vmem:[%s1311_s25 + $0xa0] sm:$0xff] }
  0x17   : > { %172 = vst [vmem:[%s1316_s26 + $0x50] sm:$0xff] %v171_v10  ;;  %174 = vst [vmem:[%s1316_s26 + $0x58] sm:$0xff] %v173_v11  ;;  %v177_v13 = vld [vmem:[%s1311_s25 + $0xa8] sm:$0xff]  ;;  %v179_v14 = vld [vmem:[%s1311_s25 + $0xb0] sm:$0xff] }
  0x18   : > { %176 = vst [vmem:[%s1316_s26 + $0x60] sm:$0xff] %v175_v12  ;;  %178 = vst [vmem:[%s1316_s26 + $0x68] sm:$0xff] %v177_v13  ;;  %v181_v15 = vld [vmem:[%s1311_s25 + $0xb8] sm:$0xff]  ;;  %v183_v16 = vld [vmem:[%s1311_s25 + $0x100] sm:$0xff] }
  0x19   : > { %180 = vst [vmem:[%s1316_s26 + $0x70] sm:$0xff] %v179_v14  ;;  %v185_v17 = vld [vmem:[%s1311_s25 + $0x108] sm:$0xff]  ;;  %182 = vst [vmem:[%s1316_s26 + $0x78] sm:$0xff] %v181_v15  ;;  %v187_v18 = vld [vmem:[%s1311_s25 + $0x110] sm:$0xff] }
  0x1a   : > { %184 = vst [vmem:[%s1316_s26 + $0x80] sm:$0xff] %v183_v16  ;;  %186 = vst [vmem:[%s1316_s26 + $0x88] sm:$0xff] %v185_v17  ;;  %v189_v19 = vld [vmem:[%s1311_s25 + $0x118] sm:$0xff]  ;;  %v191_v20 = vld [vmem:[%s1311_s25 + $0x120] sm:$0xff] }
  0x1b   : > { %188 = vst [vmem:[%s1316_s26 + $0x90] sm:$0xff] %v187_v18  ;;  %190 = vst [vmem:[%s1316_s26 + $0x98] sm:$0xff] %v189_v19  ;;  %v193_v21 = vld [vmem:[%s1311_s25 + $0x128] sm:$0xff]  ;;  %v195_v22 = vld [vmem:[%s1311_s25 + $0x130] sm:$0xff] }
  0x1c   : > { %192 = vst [vmem:[%s1316_s26 + $0xa0] sm:$0xff] %v191_v20  ;;  %v197_v23 = vld [vmem:[%s1311_s25 + $0x138] sm:$0xff]  ;;  %194 = vst [vmem:[%s1316_s26 + $0xa8] sm:$0xff] %v193_v21  ;;  %v199_v24 = vld [vmem:[%s1311_s25 + $0x180] sm:$0xff] }
  0x1d   : > { %196 = vst [vmem:[%s1316_s26 + $0xb0] sm:$0xff] %v195_v22  ;;  %198 = vst [vmem:[%s1316_s26 + $0xb8] sm:$0xff] %v197_v23  ;;  %v201_v25 = vld [vmem:[%s1311_s25 + $0x188] sm:$0xff]  ;;  %v203_v26 = vld [vmem:[%s1311_s25 + $0x190] sm:$0xff] }
  0x1e   : > { %200 = vst [vmem:[%s1316_s26 + $0xc0] sm:$0xff] %v199_v24  ;;  %202 = vst [vmem:[%s1316_s26 + $0xc8] sm:$0xff] %v201_v25  ;;  %v205_v27 = vld [vmem:[%s1311_s25 + $0x198] sm:$0xff]  ;;  %v207_v28 = vld [vmem:[%s1311_s25 + $0x1a0] sm:$0xff] }
  0x1f   : > { %204 = vst [vmem:[%s1316_s26 + $0xd0] sm:$0xff] %v203_v26  ;;  %v209_v29 = vld [vmem:[%s1311_s25 + $0x1a8] sm:$0xff]  ;;  %206 = vst [vmem:[%s1316_s26 + $0xd8] sm:$0xff] %v205_v27  ;;  %v211_v30 = vld [vmem:[%s1311_s25 + $0x1b0] sm:$0xff] }
  0x20   : > { %208 = vst [vmem:[%s1316_s26 + $0xe0] sm:$0xff] %v207_v28  ;;  %210 = vst [vmem:[%s1316_s26 + $0xe8] sm:$0xff] %v209_v29  ;;  %v213_v31 = vld [vmem:[%s1311_s25 + $0x1b8] sm:$0xff] }
  0x21   : > { %212 = vst [vmem:[%s1316_s26 + $0xf0] sm:$0xff] %v211_v30  ;;  %214 = vst [vmem:[%s1316_s26 + $0xf8] sm:$0xff] %v213_v31 }
  0x22 PF: > { %p977_p5 = scmp.ge.s32.totalorder %s1254_s14, 1  ;;  %p219_p6 = scmp.lt.s32.totalorder %s1254_s14, 3 }
  0x24   : > { %p220_p7 = pnand %p977_p5, %p219_p6 }
  0x25   : > { %v1159_v32 = vld [vmem:[%s1554_s1 + $0x40] sm:$0xff] (!%p220_p7)   ;;  %v1256_v33 = vmov (!%p220_p7), 0   ;;  %v1162_v36 = vld [vmem:[%s1554_s1 + $0x48] sm:$0xff] (!%p220_p7)   ;;  %v1165_v39 = vld [vmem:[%s1554_s1 + $0x50] sm:$0xff] (!%p220_p7)   ;;  %s226_s9 = sand.u32 (!%p220_p7), 1, %s1246_s12   ;;  %vm641_vm0 = vcmask (!%p220_p7), 130048  }
  0x26   : > { %223 = sbr.rel (%p220_p7) target bundleno = 357 (0x165), region = 51  ;;  %763 = vmatprep.subr.bf16.mxu1 (!%p220_p7), %v1256_v33  ;;  %v1160_v34 = vld [vmem:[%s1554_s1 + $0x80] sm:$0xff] (!%p220_p7)   ;;  %1070 = vmatprep.subr.bf16.mxu0 (!%p220_p7), %v1159_v32  ;;  %v1163_v37 = vld [vmem:[%s1554_s1 + $0x88] sm:$0xff] (!%p220_p7)   ;;  %v1166_v40 = vld [vmem:[%s1554_s1 + $0x90] sm:$0xff] (!%p220_p7)   ;;  %s978_s20 = sshll.u32 (!%p220_p7), %s226_s9, 8 }
  0x27   : > { %v1161_v35 = vld [vmem:[%s1554_s1] sm:$0xff] (!%p220_p7)   ;;  %764 = vmatpush1.bf16.msra.mxu1 (!%p220_p7), %v1160_v34  ;;  %v1164_v38 = vld [vmem:[%s1554_s1 + $0x8] sm:$0xff] (!%p220_p7)   ;;  %v1167_v41 = vld [vmem:[%s1554_s1 + $0x10] sm:$0xff] (!%p220_p7)   ;;  %s1455_s30 = scalar_lea.vmem (!%p220_p7), [#allocation2], %s978_s20  ;;  %s979_s10 = sshll.u32 (!%p220_p7), %s969_s15, 2 }
  0x28   : > { %1071 = vmatpush3.bf16.msra.mxu0 (!%p220_p7), %v1161_v35  ;;  %765 = vmatprep.subr.bf16.mxu1 (!%p220_p7), %v1256_v33  ;;  %v1168_v42 = vld [vmem:[%s1554_s1 + $0x58] sm:$0xff] (!%p220_p7)   ;;  %v1171_v45 = vld [vmem:[%s1554_s1 + $0x60] sm:$0xff] (!%p220_p7)   ;;  %v1174_v48 = vld [vmem:[%s1554_s1 + $0x68] sm:$0xff] (!%p220_p7)   ;;  %p251_p8 = scmp.lt.s32.totalorder (!%p220_p7), %s979_s10, 7 }
  0x29   : > { %1072 = vmatprep.subr.bf16.mxu0 (!%p220_p7), %v1162_v36  ;;  %v1169_v43 = vld [vmem:[%s1554_s1 + $0x98] sm:$0xff] (!%p220_p7)   ;;  %v1172_v46 = vld [vmem:[%s1554_s1 + $0xa0] sm:$0xff] (!%p220_p7)   ;;  %v1175_v49 = vld [vmem:[%s1554_s1 + $0xa8] sm:$0xff] (!%p220_p7)  }
  0x2a   : > { %v1170_v44 = vld [vmem:[%s1554_s1 + $0x18] sm:$0xff] (!%p220_p7)   ;;  %v1173_v47 = vld [vmem:[%s1554_s1 + $0x20] sm:$0xff] (!%p220_p7)   ;;  %v1176_v50 = vld [vmem:[%s1554_s1 + $0x28] sm:$0xff] (!%p220_p7)  }
  0x2b   : > { %766 = vmatpush1.bf16.msra.mxu1 (!%p220_p7), %v1163_v37  ;;  %v1177_v51 = vld [vmem:[%s1554_s1 + $0x70] sm:$0xff] (!%p220_p7)   ;;  %v1180_v54 = vld [vmem:[%s1554_s1 + $0x78] sm:$0xff] (!%p220_p7)   ;;  %v1186_v60 = vld [vmem:[%s1554_s1 + $0xc0] sm:$0xff] (!%p220_p7)  }
  0x2c   : > { %1073 = vmatpush3.bf16.msra.mxu0 (!%p220_p7), %v1164_v38  ;;  %767 = vmatprep.subr.bf16.mxu1 (!%p220_p7), %v1256_v33  ;;  %v1178_v52 = vld [vmem:[%s1554_s1 + $0xb0] sm:$0xff] (!%p220_p7)   ;;  %v1181_v56 = vld [vmem:[%s1554_s1 + $0xb8] sm:$0xff] (!%p220_p7)  }
  0x2d   : > { %1074 = vmatprep.subr.bf16.mxu0 %v1165_v39  ;;  %v1179_v53 = vld [vmem:[%s1554_s1 + $0x30] sm:$0xff]   ;;  %v1189_v57 = vld [vmem:[%s1455_s30 + $0xc] ss:$16 sps:$4 sm:$0xff]   ;;  %v1187_v62 = vld [vmem:[%s1455_s30 + $0x8] ss:$16 sps:$4 sm:$0xff]   ;;  %s1561_s10 = smov (!%p251_p8, %s979_s10), 7 }
  0x2e   : > { %v1185_v55 = vld [vmem:[%s1455_s30 + $0x4] ss:$16 sps:$4 sm:$0xff]   ;;  %v1182_v58 = vld [vmem:[%s1554_s1 + $0x38] sm:$0xff]   ;;  %1038 = vmatprep.mubr.msk.bf16.mxu1 %vm641_vm0, %v1189_v57  ;;  %v1183_v59 = vld [vmem:[%s1455_s30] ss:$16 sps:$4 sm:$0xff]   ;;  %s980_s14 = sshll.u32 %s1561_s10, 2 }
  0x2f   : > { %768 = vmatpush1.bf16.msra.mxu1 %v1166_v40  ;;  %698 = vmatprep.mubr.bf16.mxu0 %v1185_v55  ;;  %v1190_v61 = vld [vmem:[%s1455_s30 + $0x24] ss:$16 sps:$4 sm:$0xff]   ;;  %v1193_v63 = vld [vmem:[%s1455_s30 + $0x2c] ss:$16 sps:$4 sm:$0xff]   ;;  %v1192_v0 = vld [vmem:[%s1455_s30 + $0x20] ss:$16 sps:$4 sm:$0xff]   ;;  %s254_s20 = scalar_lea.vmem %s1556_s3, %s980_s14 }
  0x30   : > { %1075 = vmatpush3.bf16.msra.mxu0 %v1167_v41  ;;  %769 = vmatprep.subr.bf16.mxu1 %v1256_v33  ;;  %v1196_v1 = vld [vmem:[%s1455_s30 + $0x44] ss:$16 sps:$4 sm:$0xff]   ;;  %v1195_v2 = vld [vmem:[%s1455_s30 + $0x28] ss:$16 sps:$4 sm:$0xff]   ;;  %v1199_v3 = vld [vmem:[%s1455_s30 + $0x4c] ss:$16 sps:$4 sm:$0xff]  }
  0x31   : > { %1076 = vmatprep.subr.bf16.mxu0 %v1168_v42  ;;  %v1198_v4 = vld [vmem:[%s1455_s30 + $0x40] ss:$16 sps:$4 sm:$0xff]   ;;  %v1202_v5 = vld [vmem:[%s1455_s30 + $0x64] ss:$16 sps:$4 sm:$0xff]   ;;  %v1201_v6 = vld [vmem:[%s1455_s30 + $0x48] ss:$16 sps:$4 sm:$0xff]  }
  0x32   : > { %v1205_v7 = vld [vmem:[%s1455_s30 + $0x6c] ss:$16 sps:$4 sm:$0xff]   ;;  %v1204_v8 = vld [vmem:[%s1455_s30 + $0x60] ss:$16 sps:$4 sm:$0xff]   ;;  %v1208_v9 = vld [vmem:[%s1455_s30 + $0x84] ss:$16 sps:$4 sm:$0xff]  }
  0x33   : > { %770 = vmatpush1.bf16.msra.mxu1 %v1169_v43  ;;  %v1207_v10 = vld [vmem:[%s1455_s30 + $0x68] ss:$16 sps:$4 sm:$0xff]   ;;  %v1211_v11 = vld [vmem:[%s1455_s30 + $0x8c] ss:$16 sps:$4 sm:$0xff]   ;;  %v1210_v12 = vld [vmem:[%s1455_s30 + $0x80] ss:$16 sps:$4 sm:$0xff]  }
  0x34   : > { %1077 = vmatpush3.bf16.msra.mxu0 %v1170_v44  ;;  %771 = vmatprep.subr.bf16.mxu1 %v1256_v33  ;;  %v1214_v13 = vld [vmem:[%s1455_s30 + $0xa4] ss:$16 sps:$4 sm:$0xff]   ;;  %v1213_v14 = vld [vmem:[%s1455_s30 + $0x88] ss:$16 sps:$4 sm:$0xff]   ;;  %v1217_v15 = vld [vmem:[%s1455_s30 + $0xac] ss:$16 sps:$4 sm:$0xff]  }
  0x35   : > { %1078 = vmatprep.subr.bf16.mxu0 %v1171_v45  ;;  %v1216_v16 = vld [vmem:[%s1455_s30 + $0xa0] ss:$16 sps:$4 sm:$0xff]   ;;  %v1220_v17 = vld [vmem:[%s1455_s30 + $0xc4] ss:$16 sps:$4 sm:$0xff]   ;;  %v1219_v18 = vld [vmem:[%s1455_s30 + $0xa8] ss:$16 sps:$4 sm:$0xff]  }
  0x36   : > { %v1223_v19 = vld [vmem:[%s1455_s30 + $0xcc] ss:$16 sps:$4 sm:$0xff]   ;;  %v1222_v20 = vld [vmem:[%s1455_s30 + $0xc0] ss:$16 sps:$4 sm:$0xff]   ;;  %v1226_v21 = vld [vmem:[%s1455_s30 + $0xe4] ss:$16 sps:$4 sm:$0xff]  }
  0x37   : > { %772 = vmatpush1.bf16.msra.mxu1 %v1172_v46  ;;  %v1225_v22 = vld [vmem:[%s1455_s30 + $0xc8] ss:$16 sps:$4 sm:$0xff]   ;;  %v1229_v23 = vld [vmem:[%s1455_s30 + $0xec] ss:$16 sps:$4 sm:$0xff]   ;;  %v1228_v24 = vld [vmem:[%s1455_s30 + $0xe0] ss:$16 sps:$4 sm:$0xff]  }
  0x38   : > { %1079 = vmatpush3.bf16.msra.mxu0 %v1173_v47  ;;  %773 = vmatprep.subr.bf16.mxu1 %v1256_v33  ;;  %v1231_v25 = vld [vmem:[%s1455_s30 + $0xe8] ss:$16 sps:$4 sm:$0xff]  }
  0x39   : > { %1080 = vmatprep.subr.bf16.mxu0 %v1174_v48 }
  0x3b   : > { %774 = vmatpush1.bf16.msra.mxu1 %v1175_v49 }
  0x3c   : > { %1081 = vmatpush3.bf16.msra.mxu0 %v1176_v50  ;;  %775 = vmatprep.subr.bf16.mxu1 %v1256_v33 }
  0x3d   : > { %1082 = vmatprep.subr.bf16.mxu0 %v1177_v51 }
  0x3f   : > { %776 = vmatpush1.bf16.msra.mxu1 %v1178_v52 }
  0x40   : > { %1083 = vmatpush3.bf16.msra.mxu0 %v1179_v53  ;;  %777 = vmatprep.subr.bf16.mxu1 %v1256_v33 }
  0x41   : > { %1084 = vmatprep.subr.bf16.mxu0 %v1180_v54 }
  0x43   : > { %778 = vmatpush1.bf16.msra.mxu1 %v1181_v56 }
  0x44   : > { %1085 = vmatpush3.bf16.msra.mxu0 %v1182_v58  ;;  %779 = vmatprep.subr.bf16.mxu1 %v1256_v33 }
  0x47   : > { %699 = vmatmul.mubr.bf16.vlgmr.msra.gmra.mrb[0].mxu0 %v1183_v59  ;;  %780 = vmatpush1.bf16.msra.mxu1 %v1186_v60 }
  0x48   : > { %706 = vmatprep.mubr.bf16.mxu0 %v1190_v61 }
  0x4a   : > { %796 = vmatmul.mubr.bf16.vlgmr.msra.gmra.mrb[0].mxu1 %v1187_v62 }
  0x4b   : > { %1039 = vmatprep.mubr.msk.bf16.mxu1 %vm641_vm0, %v1193_v63 }
  0x4f   : > { %707 = vmatmul.mubr.bf16.gmra.mrb[4].mxu0 %v1192_v0 }
  0x50   : > { %714 = vmatprep.mubr.bf16.mxu0 %v1196_v1 }
  0x52   : > { %804 = vmatmul.mubr.bf16.gmra.mrb[4].mxu1 %v1195_v2 }
  0x53   : > { %1040 = vmatprep.mubr.msk.bf16.mxu1 %vm641_vm0, %v1199_v3 }
  0x57   : > { %715 = vmatmul.mubr.bf16.gmra.mrb[8].mxu0 %v1198_v4 }
  0x58   : > { %722 = vmatprep.mubr.bf16.mxu0 %v1202_v5 }
  0x5a   : > { %812 = vmatmul.mubr.bf16.gmra.mrb[8].mxu1 %v1201_v6 }
  0x5b   : > { %1041 = vmatprep.mubr.msk.bf16.mxu1 %vm641_vm0, %v1205_v7 }
  0x5f   : > { %723 = vmatmul.mubr.bf16.gmra.mrb[12].mxu0 %v1204_v8 }
  0x60   : > { %730 = vmatprep.mubr.bf16.mxu0 %v1208_v9 }
  0x62   : > { %820 = vmatmul.mubr.bf16.gmra.mrb[12].mxu1 %v1207_v10 }
  0x63   : > { %1042 = vmatprep.mubr.msk.bf16.mxu1 %vm641_vm0, %v1211_v11 }
  0x67   : > { %731 = vmatmul.mubr.bf16.gmra.mrb[16].mxu0 %v1210_v12 }
  0x68   : > { %738 = vmatprep.mubr.bf16.mxu0 %v1214_v13 }
  0x6a   : > { %828 = vmatmul.mubr.bf16.gmra.mrb[16].mxu1 %v1213_v14 }
  0x6b   : > { %1043 = vmatprep.mubr.msk.bf16.mxu1 %vm641_vm0, %v1217_v15 }
  0x6f   : > { %739 = vmatmul.mubr.bf16.gmra.mrb[20].mxu0 %v1216_v16 }
  0x70   : > { %746 = vmatprep.mubr.bf16.mxu0 %v1220_v17 }
  0x72   : > { %836 = vmatmul.mubr.bf16.gmra.mrb[20].mxu1 %v1219_v18 }
  0x73   : > { %1044 = vmatprep.mubr.msk.bf16.mxu1 %vm641_vm0, %v1223_v19 }
  0x77   : > { %747 = vmatmul.mubr.bf16.gmra.mrb[24].mxu0 %v1222_v20 }
  0x78   : > { %754 = vmatprep.mubr.bf16.mxu0 %v1226_v21 }
  0x7a   : > { %844 = vmatmul.mubr.bf16.gmra.mrb[24].mxu1 %v1225_v22 }
  0x7b   : > { %1045 = vmatprep.mubr.msk.bf16.mxu1 %vm641_vm0, %v1229_v23 }
  0x7f   : > { %755 = vmatmul.mubr.bf16.gmra.mrb[28].mxu0 %v1228_v24 }
  0x82   : > { %852 = vmatmul.mubr.bf16.gmra.mrb[28].mxu1 %v1231_v25 }
 0x11a   : > { %v1086_v26 = vpop.f32.mrb[0].mxu0 }
 0x11b   : > { %v1087_v27 = vpop.f32.mrb[1].mxu0 }
 0x11c   : > { %v1088_v28 = vadd.f32 %v1087_v27, %v1086_v26  ;;  %v1089_v29 = vpop.f32.mrb[2].mxu0 }
 0x11d   : > { %v1090_v30 = vpop.f32.mrb[3].mxu0  ;;  %v797_v31 = vpop.f32.mrb[0].mxu1 }
 0x11e   : > { %v1091_v32 = vadd.f32 %v1090_v30, %v1089_v29  ;;  %v1508_v33 = vadd.f32 %v1088_v28, %v797_v31  ;;  %v799_v34 = vpop.f32.mrb[1].mxu1 }
 0x11f   : > { %v800_v35 = vpop.f32.mrb[2].mxu1 }
 0x120   : > { %v1510_v36 = vadd.f32 %v1091_v32, %v800_v35  ;;  %v802_v37 = vpop.f32.mrb[3].mxu1 }
 0x122   : > { %v1092_v38 = vpop.f32.mrb[4].mxu0 }
 0x123   : > { %v1093_v39 = vpop.f32.mrb[5].mxu0 }
 0x124   : > { %v1094_v40 = vadd.f32 %v1093_v39, %v1092_v38  ;;  %v1095_v41 = vpop.f32.mrb[6].mxu0 }
 0x125   : > { %v1096_v42 = vpop.f32.mrb[7].mxu0  ;;  %v805_v43 = vpop.f32.mrb[4].mxu1 }
 0x126   : > { %v1097_v44 = vadd.f32 %v1096_v42, %v1095_v41  ;;  %v1512_v45 = vadd.f32 %v1094_v40, %v805_v43  ;;  %v807_v46 = vpop.f32.mrb[5].mxu1 }
 0x127   : > { %v808_v47 = vpop.f32.mrb[6].mxu1 }
 0x128   : > { %v1514_v48 = vadd.f32 %v1097_v44, %v808_v47  ;;  %v810_v49 = vpop.f32.mrb[7].mxu1 }
 0x12a   : > { %v1098_v50 = vpop.f32.mrb[8].mxu0 }
 0x12b   : > { %v1099_v51 = vpop.f32.mrb[9].mxu0 }
 0x12c   : > { %v1100_v52 = vadd.f32 %v1099_v51, %v1098_v50  ;;  %v1101_v53 = vpop.f32.mrb[10].mxu0 }
 0x12d   : > { %v1102_v54 = vpop.f32.mrb[11].mxu0  ;;  %v813_v55 = vpop.f32.mrb[8].mxu1 }
 0x12e   : > { %v1103_v56 = vadd.f32 %v1102_v54, %v1101_v53  ;;  %v814_v57 = vadd.f32 %v1100_v52, %v813_v55  ;;  %v815_v58 = vpop.f32.mrb[9].mxu1  ;;  %v1046_v53 = vld [vmem:[%s1555_s2] ss:$0 sm:$0xff] }
 0x12f   : > { %v816_v59 = vpop.f32.mrb[10].mxu1 }
 0x130   : > { %v860_v60 = vmax.f32 %v1508_v33, %v814_v57  ;;  %v1517_v61 = vadd.f32 %v1103_v56, %v816_v59  ;;  %v818_v62 = vpop.f32.mrb[11].mxu1 }
 0x132   : > { %v861_v63 = vmax.f32 %v1510_v36, %v1517_v61  ;;  %v1104_v0 = vpop.f32.mrb[12].mxu0 }
 0x133   : > { %v1105_v1 = vpop.f32.mrb[13].mxu0 }
 0x134   : > { %v1106_v2 = vadd.f32 %v1105_v1, %v1104_v0  ;;  %v1107_v3 = vpop.f32.mrb[14].mxu0 }
 0x135   : > { %v1108_v4 = vpop.f32.mrb[15].mxu0  ;;  %v821_v5 = vpop.f32.mrb[12].mxu1 }
 0x136   : > { %v1109_v6 = vadd.f32 %v1108_v4, %v1107_v3  ;;  %v1521_v7 = vadd.f32 %v1106_v2, %v821_v5  ;;  %v823_v8 = vpop.f32.mrb[13].mxu1 }
 0x137   : > { %v824_v9 = vpop.f32.mrb[14].mxu1 }
 0x138   : > { %v862_v10 = vmax.f32 %v1512_v45, %v1521_v7  ;;  %v1525_v11 = vadd.f32 %v1109_v6, %v824_v9  ;;  %v826_v12 = vpop.f32.mrb[15].mxu1 }
 0x13a   : > { %v863_v13 = vmax.f32 %v1514_v48, %v1525_v11  ;;  %v1110_v14 = vpop.f32.mrb[16].mxu0 }
 0x13b   : > { %v1111_v15 = vpop.f32.mrb[17].mxu0 }
 0x13c   : > { %v1112_v16 = vadd.f32 %v1111_v15, %v1110_v14  ;;  %v1113_v17 = vpop.f32.mrb[18].mxu0 }
 0x13d   : > { %v1114_v18 = vpop.f32.mrb[19].mxu0  ;;  %v829_v19 = vpop.f32.mrb[16].mxu1 }
 0x13e   : > { %v1115_v20 = vadd.f32 %v1114_v18, %v1113_v17  ;;  %v830_v21 = vadd.f32 %v1112_v16, %v829_v19  ;;  %v831_v22 = vpop.f32.mrb[17].mxu1 }
 0x13f   : > { %v832_v23 = vpop.f32.mrb[18].mxu1 }
 0x140   : > { %v833_v24 = vadd.f32 %v1115_v20, %v832_v23  ;;  %v834_v25 = vpop.f32.mrb[19].mxu1 }
 0x142   : > { %v1116_v26 = vpop.f32.mrb[20].mxu0 }
 0x143   : > { %v1117_v27 = vpop.f32.mrb[21].mxu0 }
 0x144   : > { %v1118_v28 = vadd.f32 %v1117_v27, %v1116_v26  ;;  %v1119_v29 = vpop.f32.mrb[22].mxu0 }
 0x145   : > { %v1120_v30 = vpop.f32.mrb[23].mxu0  ;;  %v837_v31 = vpop.f32.mrb[20].mxu1 }
 0x146   : > { %v1121_v32 = vadd.f32 %v1120_v30, %v1119_v29  ;;  %v838_v33 = vadd.f32 %v1118_v28, %v837_v31  ;;  %v839_v34 = vpop.f32.mrb[21].mxu1 }
 0x147   : > { %v840_v35 = vpop.f32.mrb[22].mxu1 }
 0x148   : > { %v841_v36 = vadd.f32 %v1121_v32, %v840_v35  ;;  %v842_v37 = vpop.f32.mrb[23].mxu1 }
 0x14a   : > { %v1122_v38 = vpop.f32.mrb[24].mxu0 }
 0x14b   : > { %v1123_v39 = vpop.f32.mrb[25].mxu0 }
 0x14c   : > { %v1124_v40 = vadd.f32 %v1123_v39, %v1122_v38  ;;  %v1125_v41 = vpop.f32.mrb[26].mxu0 }
 0x14d   : > { %v1126_v42 = vpop.f32.mrb[27].mxu0  ;;  %v845_v43 = vpop.f32.mrb[24].mxu1 }
 0x14e   : > { %v1127_v44 = vadd.f32 %v1126_v42, %v1125_v41  ;;  %v846_v46 = vadd.f32 %v1124_v40, %v845_v43  ;;  %v847_v47 = vpop.f32.mrb[25].mxu1 }
 0x14f   : > { %v848_v49 = vpop.f32.mrb[26].mxu1 }
 0x150   : > { %v864_v50 = vmax.f32 %v830_v21, %v846_v46  ;;  %v849_v51 = vadd.f32 %v1127_v44, %v848_v49  ;;  %v850_v52 = vpop.f32.mrb[27].mxu1 }
 0x152   : > { %v868_v54 = vmax.f32 %v860_v60, %v864_v50  ;;  %v865_v55 = vmax.f32 %v833_v24, %v849_v51  ;;  %v1128_v56 = vpop.f32.mrb[28].mxu0 }
 0x153   : > { %v1129_v57 = vpop.f32.mrb[29].mxu0 }
 0x154   : > { %v879_v58 = vadd.f32 %v1046_v53, %v868_v54  ;;  %v869_v59 = vmax.f32 %v861_v63, %v865_v55  ;;  %v1130_v61 = vadd.f32 %v1129_v57, %v1128_v56  ;;  %v1131_v62 = vpop.f32.mrb[30].mxu0 }
 0x155   : > { %v1132_v0 = vpop.f32.mrb[31].mxu0  ;;  %v853_v1 = vpop.f32.mrb[28].mxu1 }
 0x156   : > { %v880_v2 = vadd.f32 %v1046_v53, %v869_v59  ;;  %v1133_v3 = vadd.f32 %v1132_v0, %v1131_v62  ;;  %v854_v4 = vadd.f32 %v1130_v61, %v853_v1  ;;  %v855_v5 = vpop.f32.mrb[29].mxu1  ;;  %v883_v8 = vmax.f32 %v879_v58, 0.0 }
 0x157   : > { %v856_v6 = vpop.f32.mrb[30].mxu1 }
 0x158   : > { %v884_v9 = vmax.f32 %v880_v2, 0.0  ;;  %v866_v12 = vmax.f32 %v838_v33, %v854_v4  ;;  %v857_v60 = vadd.f32 %v1133_v3, %v856_v6  ;;  %v858_v14 = vpop.f32.mrb[31].mxu1 }
 0x15a   : > { %v1062_v63 = vpack.c.bf16 %v884_v9, %v883_v8  ;;  %v870_v15 = vmax.f32 %v862_v10, %v866_v12  ;;  %v867_v16 = vmax.f32 %v841_v36, %v857_v60 }
 0x15c   : > { %1063 = vst [vmem:[%s254_s20] sm:$0xff] %v1062_v63   ;;  %v881_v17 = vadd.f32 %v1046_v53, %v870_v15  ;;  %v871_v18 = vmax.f32 %v863_v13, %v867_v16 }
 0x15e   : > { %v882_v19 = vadd.f32 %v1046_v53, %v871_v18  ;;  %v885_v20 = vmax.f32 %v881_v17, 0.0 }
 0x160   : > { %v886_v21 = vmax.f32 %v882_v19, 0.0 }
 0x162   : > { %v1067_v22 = vpack.c.bf16 %v886_v21, %v885_v20 }
 0x164   : > { %1069 = vst [vmem:[%s254_s20 + $0x8] sm:$0xff] %v1067_v22  }
 0x165 PF: > { %p10_p9 = scmp.ge.s32.totalorder %s1294_s16, 4   ;;  %s1557_s12 = smov %s1250_s13 }
 0x166   : > { %s1558_s13 = smov %s1303_s19  ;;  %s1559_s14 = smov %s1294_s16 }
 0x167   :  { %12 = sbr.rel (!%p10_p9) target bundleno = 2 (0x2), region = 90 }

// kernel: cnn_forward.5
= control target key start
LH: loop header
LB: loop body
LE: loop exit
PB: predicated region body
PF: predicated region fallthrough
CT: control target
= control target key end

     0   :  { %vm3406_vm0 = vmmov 0   ;;  %s4215_s1 = inlined_call_operand.vmem [shape: bf16[3200,128], index: 1, kind: input, shape index: {}]   ;;  %s4216_s0 = inlined_call_operand.vmem [shape: bf16[16,3200], index: 0, kind: input, shape index: {}]   ;;  %s4217_s2 = inlined_call_operand.vmem [shape: f32[1,128], index: 2, kind: input, shape index: {}]   ;;  %s4218_s3 = inlined_call_operand.vmem [shape: bf16[128,128], index: 3, kind: input, shape index: {}]   ;;  %s4219_s5 = inlined_call_operand.vmem [shape: bf16[128,128], index: 5, kind: input, shape index: {}]   ;;  %s4220_s4 = inlined_call_operand.vmem [shape: f32[1,128], index: 4, kind: input, shape index: {}]   ;;  %s4221_s6 = inlined_call_operand.vmem [shape: f32[1,128], index: 6, kind: input, shape index: {}]   ;;  %s4222_s7 = inlined_call_operand.vmem [shape: f32[16,128], index: 7, kind: output, shape index: {}]  }
   0x1   :  { %v3152_v0 = vld [vmem:[%s4215_s1 + $0x40] sm:$0xff]   ;;  %v3156_v4 = vld [vmem:[%s4215_s1 + $0x48] sm:$0xff]   ;;  %v3160_v8 = vld [vmem:[%s4215_s1 + $0x50] sm:$0xff]  }
   0x2   :  { %v3153_v1 = vld [vmem:[%s4215_s1] sm:$0xff]   ;;  %2799 = vmatprep.subr.bf16.mxu0 %v3152_v0  ;;  %v3157_v5 = vld [vmem:[%s4215_s1 + $0x8] sm:$0xff]   ;;  %v3161_v9 = vld [vmem:[%s4215_s1 + $0x10] sm:$0xff]  }
   0x3   :  { %v3154_v2 = vld [vmem:[%s4215_s1 + $0xc0] sm:$0xff]   ;;  %2800 = vmatpush3.bf16.msra.mxu0 %v3153_v1  ;;  %v3158_v6 = vld [vmem:[%s4215_s1 + $0xc8] sm:$0xff]   ;;  %v3162_v10 = vld [vmem:[%s4215_s1 + $0xd0] sm:$0xff]  }
   0x4   :  { %v3155_v3 = vld [vmem:[%s4215_s1 + $0x80] sm:$0xff]   ;;  %2821 = vmatprep.subr.bf16.mxu1 %v3154_v2  ;;  %2801 = vmatprep.subr.bf16.mxu0 %v3156_v4  ;;  %v3159_v7 = vld [vmem:[%s4215_s1 + $0x88] sm:$0xff]   ;;  %v3163_v11 = vld [vmem:[%s4215_s1 + $0x90] sm:$0xff]  }
   0x5   :  { %2822 = vmatpush3.bf16.msra.mxu1 %v3155_v3  ;;  %v3164_v12 = vld [vmem:[%s4215_s1 + $0x58] sm:$0xff]   ;;  %v3168_v16 = vld [vmem:[%s4215_s1 + $0x60] sm:$0xff]   ;;  %v3172_v20 = vld [vmem:[%s4215_s1 + $0x68] sm:$0xff]  }
   0x6   :  { %2823 = vmatprep.subr.bf16.mxu1 %v3158_v6  ;;  %v3165_v13 = vld [vmem:[%s4215_s1 + $0x18] sm:$0xff]   ;;  %v3169_v17 = vld [vmem:[%s4215_s1 + $0x20] sm:$0xff]   ;;  %v3173_v21 = vld [vmem:[%s4215_s1 + $0x28] sm:$0xff]  }
   0x7   :  { %2802 = vmatpush3.bf16.msra.mxu0 %v3157_v5  ;;  %v3166_v14 = vld [vmem:[%s4215_s1 + $0xd8] sm:$0xff]   ;;  %v3170_v18 = vld [vmem:[%s4215_s1 + $0xe0] sm:$0xff]   ;;  %v3174_v22 = vld [vmem:[%s4215_s1 + $0xe8] sm:$0xff]  }
   0x8   :  { %2803 = vmatprep.subr.bf16.mxu0 %v3160_v8  ;;  %v3167_v15 = vld [vmem:[%s4215_s1 + $0x98] sm:$0xff]   ;;  %v3171_v19 = vld [vmem:[%s4215_s1 + $0xa0] sm:$0xff]   ;;  %v3175_v23 = vld [vmem:[%s4215_s1 + $0xa8] sm:$0xff]  }
   0x9   :  { %2824 = vmatpush3.bf16.msra.mxu1 %v3159_v7  ;;  %v3176_v24 = vld [vmem:[%s4215_s1 + $0x70] sm:$0xff]   ;;  %v3180_v28 = vld [vmem:[%s4215_s1 + $0x78] sm:$0xff]   ;;  %v3183_v31 = vld [vmem:[%s4216_s0] ss:$100 sps:$4 sm:$0xff]  }
   0xa   :  { %2825 = vmatprep.subr.bf16.mxu1 %v3162_v10  ;;  %v3177_v25 = vld [vmem:[%s4215_s1 + $0x30] sm:$0xff]   ;;  %v3181_v29 = vld [vmem:[%s4215_s1 + $0x38] sm:$0xff]   ;;  %v3185_v32 = vld [vmem:[%s4216_s0 + $0x4] ss:$100 sps:$4 sm:$0xff]  }
   0xb   :  { %2804 = vmatpush3.bf16.msra.mxu0 %v3161_v9  ;;  %v3178_v26 = vld [vmem:[%s4215_s1 + $0xf0] sm:$0xff]   ;;  %v3182_v30 = vld [vmem:[%s4215_s1 + $0xf8] sm:$0xff]   ;;  %1818 = vmatprep.mubr.bf16.mxu0 %v3185_v32  ;;  %v3187_v34 = vld [vmem:[%s4215_s1 + $0x140] sm:$0xff]  }
   0xc   :  { %2805 = vmatprep.subr.bf16.mxu0 %v3164_v12  ;;  %v3179_v27 = vld [vmem:[%s4215_s1 + $0xb0] sm:$0xff]   ;;  %v3186_v33 = vld [vmem:[%s4215_s1 + $0xb8] sm:$0xff]   ;;  %v3188_v35 = vld [vmem:[%s4216_s0 + $0x8] ss:$100 sps:$4 sm:$0xff]  }
   0xd   :  { %2826 = vmatpush3.bf16.msra.mxu1 %v3163_v11  ;;  %v3190_v36 = vld [vmem:[%s4216_s0 + $0xc] ss:$100 sps:$4 sm:$0xff]   ;;  %v3191_v37 = vld [vmem:[%s4215_s1 + $0x100] sm:$0xff]   ;;  %v3202_v48 = vld [vmem:[%s4215_s1 + $0x158] sm:$0xff]  }
   0xe   :  { %2827 = vmatprep.subr.bf16.mxu1 %v3166_v14  ;;  %1859 = vmatprep.mubr.bf16.mxu1 %v3190_v36  ;;  %v3192_v38 = vld [vmem:[%s4215_s1 + $0x1c0] sm:$0xff]   ;;  %v3194_v40 = vld [vmem:[%s4215_s1 + $0x148] sm:$0xff]   ;;  %v3198_v44 = vld [vmem:[%s4215_s1 + $0x150] sm:$0xff]  }
   0xf   :  { %2806 = vmatpush3.bf16.msra.mxu0 %v3165_v13  ;;  %v3193_v39 = vld [vmem:[%s4215_s1 + $0x180] sm:$0xff]   ;;  %v3195_v41 = vld [vmem:[%s4215_s1 + $0x108] sm:$0xff]   ;;  %v3199_v45 = vld [vmem:[%s4215_s1 + $0x110] sm:$0xff]  }
  0x10   :  { %2807 = vmatprep.subr.bf16.mxu0 %v3168_v16  ;;  %v3196_v42 = vld [vmem:[%s4215_s1 + $0x1c8] sm:$0xff]   ;;  %v3200_v46 = vld [vmem:[%s4215_s1 + $0x1d0] sm:$0xff]   ;;  %v3203_v49 = vld [vmem:[%s4215_s1 + $0x118] sm:$0xff]  }
  0x11   :  { %2828 = vmatpush3.bf16.msra.mxu1 %v3167_v15  ;;  %v3197_v43 = vld [vmem:[%s4215_s1 + $0x188] sm:$0xff]   ;;  %v3201_v47 = vld [vmem:[%s4215_s1 + $0x190] sm:$0xff]   ;;  %v3204_v50 = vld [vmem:[%s4215_s1 + $0x1d8] sm:$0xff]  }
  0x12   :  { %2829 = vmatprep.subr.bf16.mxu1 %v3170_v18  ;;  %v3205_v51 = vld [vmem:[%s4215_s1 + $0x198] sm:$0xff]   ;;  %v3206_v52 = vld [vmem:[%s4215_s1 + $0x160] sm:$0xff]   ;;  %v3210_v56 = vld [vmem:[%s4215_s1 + $0x168] sm:$0xff]  }
  0x13   :  { %2808 = vmatpush3.bf16.msra.mxu0 %v3169_v17  ;;  %v3207_v53 = vld [vmem:[%s4215_s1 + $0x120] sm:$0xff]   ;;  %v3211_v57 = vld [vmem:[%s4215_s1 + $0x128] sm:$0xff]   ;;  %v3214_v60 = vld [vmem:[%s4215_s1 + $0x170] sm:$0xff]  }
  0x14   :  { %2809 = vmatprep.subr.bf16.mxu0 %v3172_v20  ;;  %v3208_v54 = vld [vmem:[%s4215_s1 + $0x1e0] sm:$0xff]   ;;  %v3212_v58 = vld [vmem:[%s4215_s1 + $0x1e8] sm:$0xff]   ;;  %v3215_v61 = vld [vmem:[%s4215_s1 + $0x130] sm:$0xff]  }
  0x15   :  { %2830 = vmatpush3.bf16.msra.mxu1 %v3171_v19  ;;  %v3209_v55 = vld [vmem:[%s4215_s1 + $0x1a0] sm:$0xff]   ;;  %v3213_v59 = vld [vmem:[%s4215_s1 + $0x1a8] sm:$0xff]   ;;  %v3216_v62 = vld [vmem:[%s4215_s1 + $0x1f0] sm:$0xff]  }
  0x16   :  { %2831 = vmatprep.subr.bf16.mxu1 %v3174_v22  ;;  %v3217_v63 = vld [vmem:[%s4215_s1 + $0x1b0] sm:$0xff]   ;;  %v3218_v0 = vld [vmem:[%s4215_s1 + $0x178] sm:$0xff]   ;;  %v3225_v6 = vld [vmem:[%s4215_s1 + $0x240] sm:$0xff]  }
  0x17   :  { %2810 = vmatpush3.bf16.msra.mxu0 %v3173_v21  ;;  %v3219_v1 = vld [vmem:[%s4215_s1 + $0x138] sm:$0xff]   ;;  %v3221_v3 = vld [vmem:[%s4216_s0 + $0x10] ss:$100 sps:$4 sm:$0xff]   ;;  %v3229_v9 = vld [vmem:[%s4215_s1 + $0x200] sm:$0xff]  }
  0x18   :  { %2811 = vmatprep.subr.bf16.mxu0 %v3176_v24  ;;  %v3220_v2 = vld [vmem:[%s4215_s1 + $0x1f8] sm:$0xff]   ;;  %v3230_v10 = vld [vmem:[%s4215_s1 + $0x2c0] sm:$0xff]   ;;  %v3232_v12 = vld [vmem:[%s4215_s1 + $0x248] sm:$0xff]  }
  0x19   :  { %2832 = vmatpush3.bf16.msra.mxu1 %v3175_v23  ;;  %v3223_v4 = vld [vmem:[%s4216_s0 + $0x14] ss:$100 sps:$4 sm:$0xff]   ;;  %v3228_v8 = vld [vmem:[%s4216_s0 + $0x1c] ss:$100 sps:$4 sm:$0xff]   ;;  %v3233_v13 = vld [vmem:[%s4215_s1 + $0x208] sm:$0xff]  }
  0x1a   :  { %2833 = vmatprep.subr.bf16.mxu1 %v3178_v26  ;;  %v3224_v5 = vld [vmem:[%s4215_s1 + $0x1b8] sm:$0xff]   ;;  %v3231_v11 = vld [vmem:[%s4215_s1 + $0x280] sm:$0xff]   ;;  %v3234_v14 = vld [vmem:[%s4215_s1 + $0x2c8] sm:$0xff]  }
  0x1b   :  { %2812 = vmatpush3.bf16.msra.mxu0 %v3177_v25  ;;  %v3226_v7 = vld [vmem:[%s4216_s0 + $0x18] ss:$100 sps:$4 sm:$0xff]   ;;  %v3235_v15 = vld [vmem:[%s4215_s1 + $0x288] sm:$0xff]   ;;  %v3236_v16 = vld [vmem:[%s4215_s1 + $0x250] sm:$0xff]  }
  0x1c   :  { %2813 = vmatprep.subr.bf16.mxu0 %v3180_v28  ;;  %v3237_v17 = vld [vmem:[%s4215_s1 + $0x210] sm:$0xff]   ;;  %v3240_v20 = vld [vmem:[%s4215_s1 + $0x258] sm:$0xff]   ;;  %v3244_v24 = vld [vmem:[%s4215_s1 + $0x260] sm:$0xff]  }
  0x1d   :  { %2834 = vmatpush3.bf16.msra.mxu1 %v3179_v27  ;;  %v3238_v18 = vld [vmem:[%s4215_s1 + $0x2d0] sm:$0xff]   ;;  %v3241_v21 = vld [vmem:[%s4215_s1 + $0x218] sm:$0xff]   ;;  %v3245_v25 = vld [vmem:[%s4215_s1 + $0x220] sm:$0xff]  }
  0x1e   :  { %2835 = vmatprep.subr.bf16.mxu1 %v3182_v30  ;;  %v3239_v19 = vld [vmem:[%s4215_s1 + $0x290] sm:$0xff]   ;;  %v3242_v22 = vld [vmem:[%s4215_s1 + $0x2d8] sm:$0xff]   ;;  %v3246_v26 = vld [vmem:[%s4215_s1 + $0x2e0] sm:$0xff]  }
  0x1f   :  { %2814 = vmatpush3.bf16.msra.mxu0 %v3181_v29  ;;  %v3243_v23 = vld [vmem:[%s4215_s1 + $0x298] sm:$0xff]   ;;  %v3247_v27 = vld [vmem:[%s4215_s1 + $0x2a0] sm:$0xff]   ;;  %v3248_v28 = vld [vmem:[%s4215_s1 + $0x268] sm:$0xff]  }
  0x20   :  { %2843 = vmatprep.subr.bf16.mxu0 %v3187_v34  ;;  %v3249_v29 = vld [vmem:[%s4215_s1 + $0x228] sm:$0xff]   ;;  %v3252_v32 = vld [vmem:[%s4215_s1 + $0x270] sm:$0xff]   ;;  %v3256_v36 = vld [vmem:[%s4215_s1 + $0x278] sm:$0xff]  }
  0x21   :  { %2836 = vmatpush3.bf16.msra.mxu1 %v3186_v33  ;;  %v3250_v30 = vld [vmem:[%s4215_s1 + $0x2e8] sm:$0xff]   ;;  %v3253_v33 = vld [vmem:[%s4215_s1 + $0x230] sm:$0xff]  }
  0x22   :  { %1819 = vmatmul.mubr.bf16.vlgmr.msra.gmra.mrb[0].mxu0 %v3183_v31  ;;  %2865 = vmatprep.subr.bf16.mxu1 %v3192_v38  ;;  %v3251_v31 = vld [vmem:[%s4215_s1 + $0x2a8] sm:$0xff]   ;;  %v3254_v34 = vld [vmem:[%s4215_s1 + $0x2f0] sm:$0xff]   ;;  %v3258_v38 = vld [vmem:[%s4215_s1 + $0x2f8] sm:$0xff]  }
  0x23   :  { %2844 = vmatpush3.bf16.msra.mxu0 %v3191_v37  ;;  %1900 = vmatprep.mubr.bf16.mxu0 %v3223_v4  ;;  %v3257_v37 = vld [vmem:[%s4215_s1 + $0x238] sm:$0xff]   ;;  %v3290_v4 = vld [vmem:[%s4215_s1 + $0x370] sm:$0xff]  }
  0x24   :  { %1860 = vmatmul.mubr.bf16.vlgmr.msra.gmra.mrb[0].mxu1 %v3188_v35  ;;  %2845 = vmatprep.subr.bf16.mxu0 %v3194_v40  ;;  %v3255_v35 = vld [vmem:[%s4215_s1 + $0x2b0] sm:$0xff]   ;;  %v3261_v40 = vld [vmem:[%s4216_s0 + $0x24] ss:$100 sps:$4 sm:$0xff]  }
  0x25   :  { %2866 = vmatpush3.bf16.msra.mxu1 %v3193_v39  ;;  %1941 = vmatprep.mubr.bf16.mxu1 %v3228_v8  ;;  %v3259_v39 = vld [vmem:[%s4216_s0 + $0x20] ss:$100 sps:$4 sm:$0xff]   ;;  %v3294_v8 = vld [vmem:[%s4215_s1 + $0x378] sm:$0xff]  }
  0x26   :  { %2867 = vmatprep.subr.bf16.mxu1 %v3196_v42  ;;  %v3263_v42 = vld [vmem:[%s4215_s1 + $0x340] sm:$0xff]  }
  0x27   :  { %2846 = vmatpush3.bf16.msra.mxu0 %v3195_v41  ;;  %v3262_v41 = vld [vmem:[%s4215_s1 + $0x2b8] sm:$0xff]  }
  0x28   :  { %2847 = vmatprep.subr.bf16.mxu0 %v3198_v44  ;;  %v3266_v44 = vld [vmem:[%s4216_s0 + $0x2c] ss:$100 sps:$4 sm:$0xff]  }
  0x29   :  { %2868 = vmatpush3.bf16.msra.mxu1 %v3197_v43  ;;  %v3264_v43 = vld [vmem:[%s4216_s0 + $0x28] ss:$100 sps:$4 sm:$0xff]  }
  0x2a   :  { %2869 = vmatprep.subr.bf16.mxu1 %v3200_v46  ;;  %v3268_v46 = vld [vmem:[%s4215_s1 + $0x3c0] sm:$0xff]  }
  0x2b   :  { %2848 = vmatpush3.bf16.msra.mxu0 %v3199_v45  ;;  %v3267_v45 = vld [vmem:[%s4215_s1 + $0x300] sm:$0xff]  }
  0x2c   :  { %2849 = vmatprep.subr.bf16.mxu0 %v3202_v48  ;;  %v3270_v48 = vld [vmem:[%s4215_s1 + $0x348] sm:$0xff]  }
  0x2d   :  { %2870 = vmatpush3.bf16.msra.mxu1 %v3201_v47  ;;  %v3269_v47 = vld [vmem:[%s4215_s1 + $0x380] sm:$0xff]  }
  0x2e   :  { %2871 = vmatprep.subr.bf16.mxu1 %v3204_v50  ;;  %v3272_v50 = vld [vmem:[%s4215_s1 + $0x3c8] sm:$0xff]  }
  0x2f   :  { %2850 = vmatpush3.bf16.msra.mxu0 %v3203_v49  ;;  %v3271_v49 = vld [vmem:[%s4215_s1 + $0x308] sm:$0xff]  }
  0x30   :  { %2851 = vmatprep.subr.bf16.mxu0 %v3206_v52  ;;  %v3274_v52 = vld [vmem:[%s4215_s1 + $0x350] sm:$0xff]  }
  0x31   :  { %2872 = vmatpush3.bf16.msra.mxu1 %v3205_v51  ;;  %v3273_v51 = vld [vmem:[%s4215_s1 + $0x388] sm:$0xff]  }
  0x32   :  { %2873 = vmatprep.subr.bf16.mxu1 %v3208_v54  ;;  %v3276_v54 = vld [vmem:[%s4215_s1 + $0x3d0] sm:$0xff]  }
  0x33   :  { %2852 = vmatpush3.bf16.msra.mxu0 %v3207_v53  ;;  %v3275_v53 = vld [vmem:[%s4215_s1 + $0x310] sm:$0xff]  }
  0x34   :  { %2853 = vmatprep.subr.bf16.mxu0 %v3210_v56  ;;  %v3278_v56 = vld [vmem:[%s4215_s1 + $0x358] sm:$0xff]  }
  0x35   :  { %2874 = vmatpush3.bf16.msra.mxu1 %v3209_v55  ;;  %v3277_v55 = vld [vmem:[%s4215_s1 + $0x390] sm:$0xff]  }
  0x36   :  { %2875 = vmatprep.subr.bf16.mxu1 %v3212_v58  ;;  %v3280_v58 = vld [vmem:[%s4215_s1 + $0x3d8] sm:$0xff]  }
  0x37   :  { %2854 = vmatpush3.bf16.msra.mxu0 %v3211_v57  ;;  %v3279_v57 = vld [vmem:[%s4215_s1 + $0x318] sm:$0xff]  }
  0x38   :  { %2855 = vmatprep.subr.bf16.mxu0 %v3214_v60  ;;  %v3282_v60 = vld [vmem:[%s4215_s1 + $0x360] sm:$0xff]  }
  0x39   :  { %2876 = vmatpush3.bf16.msra.mxu1 %v3213_v59  ;;  %v3281_v59 = vld [vmem:[%s4215_s1 + $0x398] sm:$0xff]  }
  0x3a   :  { %2877 = vmatprep.subr.bf16.mxu1 %v3216_v62  ;;  %v3284_v62 = vld [vmem:[%s4215_s1 + $0x3e0] sm:$0xff]  }
  0x3b   :  { %2856 = vmatpush3.bf16.msra.mxu0 %v3215_v61  ;;  %v3283_v61 = vld [vmem:[%s4215_s1 + $0x320] sm:$0xff]  }
  0x3c   :  { %2857 = vmatprep.subr.bf16.mxu0 %v3218_v0  ;;  %v3286_v0 = vld [vmem:[%s4215_s1 + $0x368] sm:$0xff]  }
  0x3d   :  { %2878 = vmatpush3.bf16.msra.mxu1 %v3217_v63  ;;  %v3285_v63 = vld [vmem:[%s4215_s1 + $0x3a0] sm:$0xff]  }
  0x3e   :  { %2879 = vmatprep.subr.bf16.mxu1 %v3220_v2  ;;  %v3288_v2 = vld [vmem:[%s4215_s1 + $0x3e8] sm:$0xff]  }
  0x3f   :  { %2858 = vmatpush3.bf16.msra.mxu0 %v3219_v1  ;;  %v3287_v1 = vld [vmem:[%s4215_s1 + $0x328] sm:$0xff]  }
  0x40   :  { %2887 = vmatprep.subr.bf16.mxu0 %v3225_v6  ;;  %v3292_v6 = vld [vmem:[%s4215_s1 + $0x3f0] sm:$0xff]  }
  0x41   :  { %2880 = vmatpush3.bf16.msra.mxu1 %v3224_v5  ;;  %v3291_v5 = vld [vmem:[%s4215_s1 + $0x330] sm:$0xff]  }
  0x42   :  { %1901 = vmatmul.mubr.bf16.vlgmr.msra.gmra.mrb[4].mxu0 %v3221_v3  ;;  %2909 = vmatprep.subr.bf16.mxu1 %v3230_v10  ;;  %v3289_v3 = vld [vmem:[%s4215_s1 + $0x3a8] sm:$0xff]   ;;  %v3296_v10 = vld [vmem:[%s4215_s1 + $0x3f8] sm:$0xff]  }
  0x43   :  { %2888 = vmatpush3.bf16.msra.mxu0 %v3229_v9  ;;  %1982 = vmatprep.mubr.bf16.mxu0 %v3261_v40  ;;  %v3295_v9 = vld [vmem:[%s4215_s1 + $0x338] sm:$0xff]   ;;  %v3328_v40 = vld [vmem:[%s4215_s1 + $0x470] sm:$0xff]  }
  0x44   :  { %1942 = vmatmul.mubr.bf16.vlgmr.msra.gmra.mrb[4].mxu1 %v3226_v7  ;;  %2889 = vmatprep.subr.bf16.mxu0 %v3232_v12  ;;  %v3293_v7 = vld [vmem:[%s4215_s1 + $0x3b0] sm:$0xff]  }
  0x45   :  { %2910 = vmatpush3.bf16.msra.mxu1 %v3231_v11  ;;  %2023 = vmatprep.mubr.bf16.mxu1 %v3266_v44  ;;  %v3297_v11 = vld [vmem:[%s4216_s0 + $0x30] ss:$100 sps:$4 sm:$0xff]   ;;  %v3332_v44 = vld [vmem:[%s4215_s1 + $0x478] sm:$0xff]  }
  0x46   :  { %2911 = vmatprep.subr.bf16.mxu1 %v3234_v14  ;;  %v3299_v12 = vld [vmem:[%s4216_s0 + $0x34] ss:$100 sps:$4 sm:$0xff]   ;;  %v3301_v14 = vld [vmem:[%s4215_s1 + $0x440] sm:$0xff]  }
  0x47   :  { %2890 = vmatpush3.bf16.msra.mxu0 %v3233_v13  ;;  %v3300_v13 = vld [vmem:[%s4215_s1 + $0x3b8] sm:$0xff]  }
  0x48   :  { %2891 = vmatprep.subr.bf16.mxu0 %v3236_v16  ;;  %v3304_v16 = vld [vmem:[%s4216_s0 + $0x3c] ss:$100 sps:$4 sm:$0xff]  }
  0x49   :  { %2912 = vmatpush3.bf16.msra.mxu1 %v3235_v15  ;;  %v3302_v15 = vld [vmem:[%s4216_s0 + $0x38] ss:$100 sps:$4 sm:$0xff]  }
  0x4a   :  { %2913 = vmatprep.subr.bf16.mxu1 %v3238_v18  ;;  %v3306_v18 = vld [vmem:[%s4215_s1 + $0x4c0] sm:$0xff]  }
  0x4b   :  { %2892 = vmatpush3.bf16.msra.mxu0 %v3237_v17  ;;  %v3305_v17 = vld [vmem:[%s4215_s1 + $0x400] sm:$0xff]  }
  0x4c   :  { %2893 = vmatprep.subr.bf16.mxu0 %v3240_v20  ;;  %v3308_v20 = vld [vmem:[%s4215_s1 + $0x448] sm:$0xff]  }
  0x4d   :  { %2914 = vmatpush3.bf16.msra.mxu1 %v3239_v19  ;;  %v3307_v19 = vld [vmem:[%s4215_s1 + $0x480] sm:$0xff]  }
  0x4e   :  { %2915 = vmatprep.subr.bf16.mxu1 %v3242_v22  ;;  %v3310_v22 = vld [vmem:[%s4215_s1 + $0x4c8] sm:$0xff]  }
  0x4f   :  { %2894 = vmatpush3.bf16.msra.mxu0 %v3241_v21  ;;  %v3309_v21 = vld [vmem:[%s4215_s1 + $0x408] sm:$0xff]  }
  0x50   :  { %2895 = vmatprep.subr.bf16.mxu0 %v3244_v24  ;;  %v3312_v24 = vld [vmem:[%s4215_s1 + $0x450] sm:$0xff]  }
  0x51   :  { %2916 = vmatpush3.bf16.msra.mxu1 %v3243_v23  ;;  %v3311_v23 = vld [vmem:[%s4215_s1 + $0x488] sm:$0xff]  }
  0x52   :  { %2917 = vmatprep.subr.bf16.mxu1 %v3246_v26  ;;  %v3314_v26 = vld [vmem:[%s4215_s1 + $0x4d0] sm:$0xff]  }
  0x53   :  { %2896 = vmatpush3.bf16.msra.mxu0 %v3245_v25  ;;  %v3313_v25 = vld [vmem:[%s4215_s1 + $0x410] sm:$0xff]  }
  0x54   :  { %2897 = vmatprep.subr.bf16.mxu0 %v3248_v28  ;;  %v3316_v28 = vld [vmem:[%s4215_s1 + $0x458] sm:$0xff]  }
  0x55   :  { %2918 = vmatpush3.bf16.msra.mxu1 %v3247_v27  ;;  %v3315_v27 = vld [vmem:[%s4215_s1 + $0x490] sm:$0xff]  }
  0x56   :  { %2919 = vmatprep.subr.bf16.mxu1 %v3250_v30  ;;  %v3318_v30 = vld [vmem:[%s4215_s1 + $0x4d8] sm:$0xff]  }
  0x57   :  { %2898 = vmatpush3.bf16.msra.mxu0 %v3249_v29  ;;  %v3317_v29 = vld [vmem:[%s4215_s1 + $0x418] sm:$0xff]  }
  0x58   :  { %2899 = vmatprep.subr.bf16.mxu0 %v3252_v32  ;;  %v3320_v32 = vld [vmem:[%s4215_s1 + $0x460] sm:$0xff]  }
  0x59   :  { %2920 = vmatpush3.bf16.msra.mxu1 %v3251_v31  ;;  %v3319_v31 = vld [vmem:[%s4215_s1 + $0x498] sm:$0xff]  }
  0x5a   :  { %2921 = vmatprep.subr.bf16.mxu1 %v3254_v34  ;;  %v3322_v34 = vld [vmem:[%s4215_s1 + $0x4e0] sm:$0xff]  }
  0x5b   :  { %2900 = vmatpush3.bf16.msra.mxu0 %v3253_v33  ;;  %v3321_v33 = vld [vmem:[%s4215_s1 + $0x420] sm:$0xff]  }
  0x5c   :  { %2901 = vmatprep.subr.bf16.mxu0 %v3256_v36  ;;  %v3324_v36 = vld [vmem:[%s4215_s1 + $0x468] sm:$0xff]  }
  0x5d   :  { %2922 = vmatpush3.bf16.msra.mxu1 %v3255_v35  ;;  %v3323_v35 = vld [vmem:[%s4215_s1 + $0x4a0] sm:$0xff]  }
  0x5e   :  { %2923 = vmatprep.subr.bf16.mxu1 %v3258_v38  ;;  %v3326_v38 = vld [vmem:[%s4215_s1 + $0x4e8] sm:$0xff]  }
  0x5f   :  { %2902 = vmatpush3.bf16.msra.mxu0 %v3257_v37  ;;  %v3325_v37 = vld [vmem:[%s4215_s1 + $0x428] sm:$0xff]  }
  0x60   :  { %2931 = vmatprep.subr.bf16.mxu0 %v3263_v42  ;;  %v3330_v42 = vld [vmem:[%s4215_s1 + $0x4f0] sm:$0xff]  }
  0x61   :  { %2924 = vmatpush3.bf16.msra.mxu1 %v3262_v41  ;;  %v3329_v41 = vld [vmem:[%s4215_s1 + $0x430] sm:$0xff]  }
  0x62   :  { %1983 = vmatmul.mubr.bf16.vlgmr.msra.gmra.mrb[8].mxu0 %v3259_v39  ;;  %2953 = vmatprep.subr.bf16.mxu1 %v3268_v46  ;;  %v3327_v39 = vld [vmem:[%s4215_s1 + $0x4a8] sm:$0xff]   ;;  %v3334_v46 = vld [vmem:[%s4215_s1 + $0x4f8] sm:$0xff]  }
  0x63   :  { %2932 = vmatpush3.bf16.msra.mxu0 %v3267_v45  ;;  %2064 = vmatprep.mubr.bf16.mxu0 %v3299_v12  ;;  %v3333_v45 = vld [vmem:[%s4215_s1 + $0x438] sm:$0xff]   ;;  %v3366_v12 = vld [vmem:[%s4215_s1 + $0x570] sm:$0xff]  }
  0x64   :  { %2024 = vmatmul.mubr.bf16.vlgmr.msra.gmra.mrb[8].mxu1 %v3264_v43  ;;  %2933 = vmatprep.subr.bf16.mxu0 %v3270_v48  ;;  %v3331_v43 = vld [vmem:[%s4215_s1 + $0x4b0] sm:$0xff]   ;;  %v3337_v48 = vld [vmem:[%s4216_s0 + $0x44] ss:$100 sps:$4 sm:$0xff]  }
  0x65   :  { %2954 = vmatpush3.bf16.msra.mxu1 %v3269_v47  ;;  %2105 = vmatprep.mubr.bf16.mxu1 %v3304_v16  ;;  %v3335_v47 = vld [vmem:[%s4216_s0 + $0x40] ss:$100 sps:$4 sm:$0xff]   ;;  %v3370_v16 = vld [vmem:[%s4215_s1 + $0x578] sm:$0xff]  }
  0x66   :  { %2955 = vmatprep.subr.bf16.mxu1 %v3272_v50  ;;  %v3339_v50 = vld [vmem:[%s4215_s1 + $0x540] sm:$0xff]  }
  0x67   :  { %2934 = vmatpush3.bf16.msra.mxu0 %v3271_v49  ;;  %v3338_v49 = vld [vmem:[%s4215_s1 + $0x4b8] sm:$0xff]  }
  0x68   :  { %2935 = vmatprep.subr.bf16.mxu0 %v3274_v52  ;;  %v3342_v52 = vld [vmem:[%s4216_s0 + $0x4c] ss:$100 sps:$4 sm:$0xff]  }
  0x69   :  { %2956 = vmatpush3.bf16.msra.mxu1 %v3273_v51  ;;  %v3340_v51 = vld [vmem:[%s4216_s0 + $0x48] ss:$100 sps:$4 sm:$0xff]  }
  0x6a   :  { %2957 = vmatprep.subr.bf16.mxu1 %v3276_v54  ;;  %v3344_v54 = vld [vmem:[%s4215_s1 + $0x5c0] sm:$0xff]  }
  0x6b   :  { %2936 = vmatpush3.bf16.msra.mxu0 %v3275_v53  ;;  %v3343_v53 = vld [vmem:[%s4215_s1 + $0x500] sm:$0xff]  }
  0x6c   :  { %2937 = vmatprep.subr.bf16.mxu0 %v3278_v56  ;;  %v3346_v56 = vld [vmem:[%s4215_s1 + $0x548] sm:$0xff]  }
  0x6d   :  { %2958 = vmatpush3.bf16.msra.mxu1 %v3277_v55  ;;  %v3345_v55 = vld [vmem:[%s4215_s1 + $0x580] sm:$0xff]  }
  0x6e   :  { %2959 = vmatprep.subr.bf16.mxu1 %v3280_v58  ;;  %v3348_v58 = vld [vmem:[%s4215_s1 + $0x5c8] sm:$0xff]  }
  0x6f   :  { %2938 = vmatpush3.bf16.msra.mxu0 %v3279_v57  ;;  %v3347_v57 = vld [vmem:[%s4215_s1 + $0x508] sm:$0xff]  }
  0x70   :  { %2939 = vmatprep.subr.bf16.mxu0 %v3282_v60  ;;  %v3350_v60 = vld [vmem:[%s4215_s1 + $0x550] sm:$0xff]  }
  0x71   :  { %2960 = vmatpush3.bf16.msra.mxu1 %v3281_v59  ;;  %v3349_v59 = vld [vmem:[%s4215_s1 + $0x588] sm:$0xff]  }
  0x72   :  { %2961 = vmatprep.subr.bf16.mxu1 %v3284_v62  ;;  %v3352_v62 = vld [vmem:[%s4215_s1 + $0x5d0] sm:$0xff]  }
  0x73   :  { %2940 = vmatpush3.bf16.msra.mxu0 %v3283_v61  ;;  %v3351_v61 = vld [vmem:[%s4215_s1 + $0x510] sm:$0xff]  }
  0x74   :  { %2941 = vmatprep.subr.bf16.mxu0 %v3286_v0  ;;  %v3354_v0 = vld [vmem:[%s4215_s1 + $0x558] sm:$0xff]  }
  0x75   :  { %2962 = vmatpush3.bf16.msra.mxu1 %v3285_v63  ;;  %v3353_v63 = vld [vmem:[%s4215_s1 + $0x590] sm:$0xff]  }
  0x76   :  { %2963 = vmatprep.subr.bf16.mxu1 %v3288_v2  ;;  %v3356_v2 = vld [vmem:[%s4215_s1 + $0x5d8] sm:$0xff]  }
  0x77   :  { %2942 = vmatpush3.bf16.msra.mxu0 %v3287_v1  ;;  %v3355_v1 = vld [vmem:[%s4215_s1 + $0x518] sm:$0xff]  }
  0x78   :  { %2943 = vmatprep.subr.bf16.mxu0 %v3290_v4  ;;  %v3358_v4 = vld [vmem:[%s4215_s1 + $0x560] sm:$0xff]  }
  0x79   :  { %2964 = vmatpush3.bf16.msra.mxu1 %v3289_v3  ;;  %v3357_v3 = vld [vmem:[%s4215_s1 + $0x598] sm:$0xff]  }
  0x7a   :  { %2965 = vmatprep.subr.bf16.mxu1 %v3292_v6  ;;  %v3360_v6 = vld [vmem:[%s4215_s1 + $0x5e0] sm:$0xff]  }
  0x7b   :  { %2944 = vmatpush3.bf16.msra.mxu0 %v3291_v5  ;;  %v3359_v5 = vld [vmem:[%s4215_s1 + $0x520] sm:$0xff]  }
  0x7c   :  { %2945 = vmatprep.subr.bf16.mxu0 %v3294_v8  ;;  %v3362_v8 = vld [vmem:[%s4215_s1 + $0x568] sm:$0xff]  }
  0x7d   :  { %2966 = vmatpush3.bf16.msra.mxu1 %v3293_v7  ;;  %v3361_v7 = vld [vmem:[%s4215_s1 + $0x5a0] sm:$0xff]  }
  0x7e   :  { %2967 = vmatprep.subr.bf16.mxu1 %v3296_v10  ;;  %v3364_v10 = vld [vmem:[%s4215_s1 + $0x5e8] sm:$0xff]  }
  0x7f   :  { %2946 = vmatpush3.bf16.msra.mxu0 %v3295_v9  ;;  %v3363_v9 = vld [vmem:[%s4215_s1 + $0x528] sm:$0xff]  }
  0x80   :  { %2975 = vmatprep.subr.bf16.mxu0 %v3301_v14  ;;  %v3368_v14 = vld [vmem:[%s4215_s1 + $0x5f0] sm:$0xff]  }
  0x81   :  { %2968 = vmatpush3.bf16.msra.mxu1 %v3300_v13  ;;  %v3367_v13 = vld [vmem:[%s4215_s1 + $0x530] sm:$0xff]  }
  0x82   :  { %2065 = vmatmul.mubr.bf16.vlgmr.msra.gmra.mrb[12].mxu0 %v3297_v11  ;;  %2997 = vmatprep.subr.bf16.mxu1 %v3306_v18  ;;  %v3365_v11 = vld [vmem:[%s4215_s1 + $0x5a8] sm:$0xff]   ;;  %v3372_v18 = vld [vmem:[%s4215_s1 + $0x5f8] sm:$0xff]  }
  0x83   :  { %2976 = vmatpush3.bf16.msra.mxu0 %v3305_v17  ;;  %2146 = vmatprep.mubr.bf16.mxu0 %v3337_v48  ;;  %v3371_v17 = vld [vmem:[%s4215_s1 + $0x538] sm:$0xff]  }
  0x84   :  { %2106 = vmatmul.mubr.bf16.vlgmr.msra.gmra.mrb[12].mxu1 %v3302_v15  ;;  %2977 = vmatprep.subr.bf16.mxu0 %v3308_v20  ;;  %v3369_v15 = vld [vmem:[%s4215_s1 + $0x5b0] sm:$0xff]  }
  0x85   :  { %2998 = vmatpush3.bf16.msra.mxu1 %v3307_v19  ;;  %2187 = vmatprep.mubr.bf16.mxu1 %v3342_v52  ;;  %v3373_v19 = vld [vmem:[%s4216_s0 + $0x50] ss:$100 sps:$4 sm:$0xff]  }
  0x86   :  { %2999 = vmatprep.subr.bf16.mxu1 %v3310_v22  ;;  %v3375_v20 = vld [vmem:[%s4216_s0 + $0x54] ss:$100 sps:$4 sm:$0xff]   ;;  %v3405_v22 = vmov 0.0  }
  0x87   :  { %2978 = vmatpush3.bf16.msra.mxu0 %v3309_v21  ;;  %v3376_v21 = vld [vmem:[%s4215_s1 + $0x5b8] sm:$0xff]  }
  0x88   :  { %2979 = vmatprep.subr.bf16.mxu0 %v3312_v24  ;;  %v3379_v24 = vld [vmem:[%s4216_s0 + $0x5c] ss:$100 sps:$4 sm:$0xff]  }
  0x89   :  { %3000 = vmatpush3.bf16.msra.mxu1 %v3311_v23  ;;  %v3377_v23 = vld [vmem:[%s4216_s0 + $0x58] ss:$100 sps:$4 sm:$0xff]  }
  0x8a   :  { %3001 = vmatprep.subr.bf16.mxu1 %v3314_v26  ;;  %v3381_v26 = vld [vmem:[%s4215_s1 + $0x608] sm:$0xff]  }
  0x8b   :  { %2980 = vmatpush3.bf16.msra.mxu0 %v3313_v25  ;;  %v3380_v25 = vld [vmem:[%s4215_s1 + $0x600] sm:$0xff]  }
  0x8c   :  { %2981 = vmatprep.subr.bf16.mxu0 %v3316_v28  ;;  %v3383_v28 = vld [vmem:[%s4215_s1 + $0x618] sm:$0xff]  }
  0x8d   :  { %3002 = vmatpush3.bf16.msra.mxu1 %v3315_v27  ;;  %v3382_v27 = vld [vmem:[%s4215_s1 + $0x610] sm:$0xff]  }
  0x8e   :  { %3003 = vmatprep.subr.bf16.mxu1 %v3318_v30  ;;  %v3385_v30 = vld [vmem:[%s4215_s1 + $0x628] sm:$0xff]  }
  0x8f   :  { %2982 = vmatpush3.bf16.msra.mxu0 %v3317_v29  ;;  %v3384_v29 = vld [vmem:[%s4215_s1 + $0x620] sm:$0xff]  }
  0x90   :  { %2983 = vmatprep.subr.bf16.mxu0 %v3320_v32  ;;  %v3387_v32 = vld [vmem:[%s4215_s1 + $0x638] sm:$0xff]  }
  0x91   :  { %3004 = vmatpush3.bf16.msra.mxu1 %v3319_v31  ;;  %v3386_v31 = vld [vmem:[%s4215_s1 + $0x630] sm:$0xff]  }
  0x92   :  { %3005 = vmatprep.subr.bf16.mxu1 %v3322_v34 }
  0x93   :  { %2984 = vmatpush3.bf16.msra.mxu0 %v3321_v33  ;;  %v3388_v33 = vld [vmem:[%s4216_s0 + $0x60] ss:$100 sps:$4 sm:$0xff]  }
  0x94   :  { %2985 = vmatprep.subr.bf16.mxu0 %v3324_v36 }
  0x95   :  { %3006 = vmatpush3.bf16.msra.mxu1 %v3323_v35  ;;  %v2555_v35 = vld [vmem:[%s4217_s2] ss:$0 sm:$0xff] }
  0x96   :  { %3007 = vmatprep.subr.bf16.mxu1 %v3326_v38 }
  0x97   :  { %2986 = vmatpush3.bf16.msra.mxu0 %v3325_v37 }
  0x98   :  { %2987 = vmatprep.subr.bf16.mxu0 %v3328_v40 }
  0x99   :  { %3008 = vmatpush3.bf16.msra.mxu1 %v3327_v39 }
  0x9a   :  { %3009 = vmatprep.subr.bf16.mxu1 %v3330_v42 }
  0x9b   :  { %2988 = vmatpush3.bf16.msra.mxu0 %v3329_v41 }
  0x9c   :  { %2989 = vmatprep.subr.bf16.mxu0 %v3332_v44 }
  0x9d   :  { %3010 = vmatpush3.bf16.msra.mxu1 %v3331_v43 }
  0x9e   :  { %3011 = vmatprep.subr.bf16.mxu1 %v3334_v46 }
  0x9f   :  { %2990 = vmatpush3.bf16.msra.mxu0 %v3333_v45 }
  0xa0   :  { %3019 = vmatprep.subr.bf16.mxu0 %v3339_v50 }
  0xa1   :  { %3012 = vmatpush3.bf16.msra.mxu1 %v3338_v49 }
  0xa2   :  { %2147 = vmatmul.mubr.bf16.vlgmr.msra.gmra.mrb[16].mxu0 %v3335_v47  ;;  %3041 = vmatprep.subr.bf16.mxu1 %v3344_v54 }
  0xa3   :  { %3020 = vmatpush3.bf16.msra.mxu0 %v3343_v53  ;;  %2228 = vmatprep.mubr.bf16.mxu0 %v3375_v20 }
  0xa4   :  { %2188 = vmatmul.mubr.bf16.vlgmr.msra.gmra.mrb[16].mxu1 %v3340_v51  ;;  %3021 = vmatprep.subr.bf16.mxu0 %v3346_v56 }
  0xa5   :  { %3042 = vmatpush3.bf16.msra.mxu1 %v3345_v55  ;;  %2269 = vmatprep.mubr.bf16.mxu1 %v3379_v24 }
  0xa6   :  { %3043 = vmatprep.subr.bf16.mxu1 %v3348_v58 }
  0xa7   :  { %3022 = vmatpush3.bf16.msra.mxu0 %v3347_v57 }
  0xa8   :  { %3023 = vmatprep.subr.bf16.mxu0 %v3350_v60 }
  0xa9   :  { %3044 = vmatpush3.bf16.msra.mxu1 %v3349_v59 }
  0xaa   :  { %3045 = vmatprep.subr.bf16.mxu1 %v3352_v62 }
  0xab   :  { %3024 = vmatpush3.bf16.msra.mxu0 %v3351_v61 }
  0xac   :  { %3025 = vmatprep.subr.bf16.mxu0 %v3354_v0 }
  0xad   :  { %3046 = vmatpush3.bf16.msra.mxu1 %v3353_v63 }
  0xae   :  { %3047 = vmatprep.subr.bf16.mxu1 %v3356_v2 }
  0xaf   :  { %3026 = vmatpush3.bf16.msra.mxu0 %v3355_v1 }
  0xb0   :  { %3027 = vmatprep.subr.bf16.mxu0 %v3358_v4  ;;  %v3390_v4 = vld [vmem:[%s4218_s3 + $0x8] sm:$0xff]  }
  0xb1   :  { %3048 = vmatpush3.bf16.msra.mxu1 %v3357_v3  ;;  %v3389_v3 = vld [vmem:[%s4218_s3] sm:$0xff]  }
  0xb2   :  { %3049 = vmatprep.subr.bf16.mxu1 %v3360_v6  ;;  %v3392_v6 = vld [vmem:[%s4218_s3 + $0x18] sm:$0xff]  }
  0xb3   :  { %3028 = vmatpush3.bf16.msra.mxu0 %v3359_v5  ;;  %v3391_v5 = vld [vmem:[%s4218_s3 + $0x10] sm:$0xff]  }
  0xb4   :  { %3029 = vmatprep.subr.bf16.mxu0 %v3362_v8 }
  0xb5   :  { %3050 = vmatpush3.bf16.msra.mxu1 %v3361_v7  ;;  %v3393_v7 = vld [vmem:[%s4218_s3 + $0x20] sm:$0xff]  }
  0xb6   :  { %3051 = vmatprep.subr.bf16.mxu1 %v3364_v10 }
  0xb7   :  { %3030 = vmatpush3.bf16.msra.mxu0 %v3363_v9 }
  0xb8   :  { %3031 = vmatprep.subr.bf16.mxu0 %v3366_v12  ;;  %v3394_v12 = vld [vmem:[%s4218_s3 + $0x28] sm:$0xff]  }
  0xb9   :  { %3052 = vmatpush3.bf16.msra.mxu1 %v3365_v11 }
  0xba   :  { %3053 = vmatprep.subr.bf16.mxu1 %v3368_v14 }
  0xbb   :  { %3032 = vmatpush3.bf16.msra.mxu0 %v3367_v13 }
  0xbc   :  { %3033 = vmatprep.subr.bf16.mxu0 %v3370_v16 }
  0xbd   :  { %3054 = vmatpush3.bf16.msra.mxu1 %v3369_v15 }
  0xbe   :  { %3055 = vmatprep.subr.bf16.mxu1 %v3372_v18 }
  0xbf   :  { %3034 = vmatpush3.bf16.msra.mxu0 %v3371_v17 }
  0xc0   :  { %3090 = vmatprep.subr.bf16.mxu0 %v3405_v22 }
  0xc1   :  { %3056 = vmatpush3.bf16.msra.mxu1 %v3376_v21 }
  0xc2   :  { %2229 = vmatmul.mubr.bf16.vlgmr.msra.gmra.mrb[20].mxu0 %v3373_v19  ;;  %3110 = vmatprep.subr.bf16.mxu1 %v3405_v22 }
  0xc3   :  { %3106 = vmatprep.mubr.msk.bf16.mxu0 %vm3406_vm0, %v3405_v22  ;;  %3091 = vmatpush3.bf16.msra.mxu0 %v3380_v25 }
  0xc4   :  { %2270 = vmatmul.mubr.bf16.vlgmr.msra.gmra.mrb[20].mxu1 %v3377_v23  ;;  %3092 = vmatprep.subr.bf16.mxu0 %v3405_v22 }
  0xc5   :  { %3126 = vmatprep.mubr.msk.bf16.mxu1 %vm3406_vm0, %v3405_v22  ;;  %3111 = vmatpush3.bf16.msra.mxu1 %v3389_v3 }
  0xc6   :  { %3112 = vmatprep.subr.bf16.mxu1 %v3405_v22 }
  0xc7   :  { %3093 = vmatpush3.bf16.msra.mxu0 %v3381_v26  ;;  %v3395_v26 = vld [vmem:[%s4218_s3 + $0x30] sm:$0xff]  }
  0xc8   :  { %3094 = vmatprep.subr.bf16.mxu0 %v3405_v22 }
  0xc9   :  { %3113 = vmatpush3.bf16.msra.mxu1 %v3390_v4 }
  0xca   :  { %3114 = vmatprep.subr.bf16.mxu1 %v3405_v22 }
  0xcb   :  { %3095 = vmatpush3.bf16.msra.mxu0 %v3382_v27  ;;  %v3396_v27 = vld [vmem:[%s4218_s3 + $0x38] sm:$0xff]  }
  0xcc   :  { %3096 = vmatprep.subr.bf16.mxu0 %v3405_v22 }
  0xcd   :  { %3115 = vmatpush3.bf16.msra.mxu1 %v3391_v5 }
  0xce   :  { %3116 = vmatprep.subr.bf16.mxu1 %v3405_v22 }
  0xcf   :  { %3097 = vmatpush3.bf16.msra.mxu0 %v3383_v28  ;;  %v3397_v28 = vld [vmem:[%s4219_s5] sm:$0xff]  }
  0xd0   :  { %3098 = vmatprep.subr.bf16.mxu0 %v3405_v22 }
  0xd1   :  { %3117 = vmatpush3.bf16.msra.mxu1 %v3392_v6 }
  0xd2   :  { %3118 = vmatprep.subr.bf16.mxu1 %v3405_v22 }
  0xd3   :  { %3099 = vmatpush3.bf16.msra.mxu0 %v3384_v29  ;;  %v3398_v29 = vld [vmem:[%s4219_s5 + $0x8] sm:$0xff]  }
  0xd4   :  { %3100 = vmatprep.subr.bf16.mxu0 %v3405_v22 }
  0xd5   :  { %3119 = vmatpush3.bf16.msra.mxu1 %v3393_v7 }
  0xd6   :  { %3120 = vmatprep.subr.bf16.mxu1 %v3405_v22 }
  0xd7   :  { %3101 = vmatpush3.bf16.msra.mxu0 %v3385_v30  ;;  %v3399_v30 = vld [vmem:[%s4219_s5 + $0x10] sm:$0xff]  }
  0xd8   :  { %3102 = vmatprep.subr.bf16.mxu0 %v3405_v22 }
  0xd9   :  { %3121 = vmatpush3.bf16.msra.mxu1 %v3394_v12 }
  0xda   :  { %3122 = vmatprep.subr.bf16.mxu1 %v3405_v22 }
  0xdb   :  { %3103 = vmatpush3.bf16.msra.mxu0 %v3386_v31  ;;  %v3400_v31 = vld [vmem:[%s4219_s5 + $0x18] sm:$0xff]  }
  0xdc   :  { %3104 = vmatprep.subr.bf16.mxu0 %v3405_v22 }
  0xdd   :  { %3123 = vmatpush3.bf16.msra.mxu1 %v3395_v26 }
  0xde   :  { %3124 = vmatprep.subr.bf16.mxu1 %v3405_v22 }
  0xdf   :  { %3105 = vmatpush3.bf16.msra.mxu0 %v3387_v32  ;;  %v3401_v32 = vld [vmem:[%s4219_s5 + $0x20] sm:$0xff]  }
  0xe0   :  { %3130 = vmatprep.subr.bf16.mxu0 %v3405_v22 }
  0xe1   :  { %3125 = vmatpush3.bf16.msra.mxu1 %v3396_v27 }
  0xe2   :  { %3107 = vmatmul.mubr.bf16.vlgmr.msra.gmra.mrb[24].mxu0 %v3388_v33 }
  0xe3   :  { %3146 = vmatprep.mubr.msk.bf16.mxu0 %vm3406_vm0, %v3405_v22  ;;  %3131 = vmatpush3.bf16.msra.mxu0 %v3397_v28  ;;  %v3403_v28 = vld [vmem:[%s4219_s5 + $0x30] sm:$0xff]  }
  0xe4   :  { %3132 = vmatprep.subr.bf16.mxu0 %v3405_v22 }
  0xe7   :  { %3133 = vmatpush3.bf16.msra.mxu0 %v3398_v29  ;;  %v3404_v29 = vld [vmem:[%s4219_s5 + $0x38] sm:$0xff]  }
  0xe8   :  { %3134 = vmatprep.subr.bf16.mxu0 %v3405_v22 }
  0xeb   :  { %3135 = vmatpush3.bf16.msra.mxu0 %v3399_v30  ;;  %v2781_v30 = vld [vmem:[%s4220_s4] ss:$0 sm:$0xff] }
  0xec   :  { %3136 = vmatprep.subr.bf16.mxu0 %v3405_v22 }
  0xef   :  { %3137 = vmatpush3.bf16.msra.mxu0 %v3400_v31 }
  0xf0   :  { %3138 = vmatprep.subr.bf16.mxu0 %v3405_v22 }
  0xf3   :  { %3139 = vmatpush3.bf16.msra.mxu0 %v3401_v32 }
  0xf4   :  { %3140 = vmatprep.subr.bf16.mxu0 %v3405_v22 }
  0xf5   :  { %v2815_v34 = vpop.f32.mrb[0].mxu0 }
  0xf6   :  { %v2816_v36 = vpop.f32.mrb[1].mxu0 }
  0xf7   :  { %v2817_v37 = vadd.f32 %v2816_v36, %v2815_v34  ;;  %v2818_v38 = vpop.f32.mrb[2].mxu0  ;;  %v2837_v39 = vpop.f32.mrb[0].mxu1 }
  0xf8   :  { %v2819_v40 = vpop.f32.mrb[3].mxu0  ;;  %v2838_v43 = vpop.f32.mrb[1].mxu1 }
  0xf9   :  { %v1821_v41 = vadd.f32 %v2817_v37, %v2555_v35  ;;  %v2820_v42 = vadd.f32 %v2819_v40, %v2818_v38  ;;  %v2839_v44 = vadd.f32 %v2838_v43, %v2837_v39  ;;  %v2840_v45 = vpop.f32.mrb[2].mxu1  ;;  %v3402_v37 = vld [vmem:[%s4219_s5 + $0x28] sm:$0xff]  }
  0xfa   :  { %v2841_v47 = vpop.f32.mrb[3].mxu1  ;;  %3141 = vmatpush3.bf16.msra.mxu0 %v3402_v37 }
  0xfb   :  { %v1824_v46 = vadd.f32 %v2820_v42, %v2555_v35  ;;  %v1862_v48 = vadd.f32 %v2839_v44, %v1821_v41  ;;  %v2842_v49 = vadd.f32 %v2841_v47, %v2840_v45  ;;  %3142 = vmatprep.subr.bf16.mxu0 %v3405_v22 }
  0xfd   :  { %v1865_v50 = vadd.f32 %v2842_v49, %v1824_v46 }
  0xfe   :  { %3143 = vmatpush3.bf16.msra.mxu0 %v3403_v28 }
  0xff   :  { %3144 = vmatprep.subr.bf16.mxu0 %v3405_v22  ;;  %v2790_v22 = vld [vmem:[%s4221_s6] ss:$0 sm:$0xff] }
 0x102   :  { %3145 = vmatpush3.bf16.msra.mxu0 %v3404_v29 }
 0x115   :  { %v2859_v51 = vpop.f32.mrb[4].mxu0 }
 0x116   :  { %v2860_v52 = vpop.f32.mrb[5].mxu0 }
 0x117   :  { %v2861_v53 = vadd.f32 %v2860_v52, %v2859_v51  ;;  %v2862_v54 = vpop.f32.mrb[6].mxu0  ;;  %v2881_v57 = vpop.f32.mrb[4].mxu1 }
 0x118   :  { %v2863_v55 = vpop.f32.mrb[7].mxu0  ;;  %v2882_v59 = vpop.f32.mrb[5].mxu1 }
 0x119   :  { %v1903_v56 = vadd.f32 %v2861_v53, %v1862_v48  ;;  %v2864_v58 = vadd.f32 %v2863_v55, %v2862_v54  ;;  %v2883_v61 = vadd.f32 %v2882_v59, %v2881_v57  ;;  %v2884_v62 = vpop.f32.mrb[6].mxu1 }
 0x11a   :  { %v2885_v63 = vpop.f32.mrb[7].mxu1 }
 0x11b   :  { %v1906_v60 = vadd.f32 %v2864_v58, %v1865_v50  ;;  %v1944_v0 = vadd.f32 %v2883_v61, %v1903_v56  ;;  %v2886_v1 = vadd.f32 %v2885_v63, %v2884_v62 }
 0x11d   :  { %v1947_v2 = vadd.f32 %v2886_v1, %v1906_v60 }
 0x135   :  { %v2903_v8 = vpop.f32.mrb[8].mxu0 }
 0x136   :  { %v2904_v9 = vpop.f32.mrb[9].mxu0 }
 0x137   :  { %v2905_v10 = vadd.f32 %v2904_v9, %v2903_v8  ;;  %v2906_v11 = vpop.f32.mrb[10].mxu0  ;;  %v2925_v13 = vpop.f32.mrb[8].mxu1 }
 0x138   :  { %v2907_v14 = vpop.f32.mrb[11].mxu0  ;;  %v2926_v17 = vpop.f32.mrb[9].mxu1 }
 0x139   :  { %v1985_v15 = vadd.f32 %v2905_v10, %v1944_v0  ;;  %v2908_v16 = vadd.f32 %v2907_v14, %v2906_v11  ;;  %v2927_v18 = vadd.f32 %v2926_v17, %v2925_v13  ;;  %v2928_v19 = vpop.f32.mrb[10].mxu1 }
 0x13a   :  { %v2929_v21 = vpop.f32.mrb[11].mxu1 }
 0x13b   :  { %v1988_v20 = vadd.f32 %v2908_v16, %v1947_v2  ;;  %v2026_v23 = vadd.f32 %v2927_v18, %v1985_v15  ;;  %v2930_v24 = vadd.f32 %v2929_v21, %v2928_v19 }
 0x13d   :  { %v2029_v25 = vadd.f32 %v2930_v24, %v1988_v20 }
 0x155   :  { %v2947_v33 = vpop.f32.mrb[12].mxu0 }
 0x156   :  { %v2948_v34 = vpop.f32.mrb[13].mxu0 }
 0x157   :  { %v2949_v35 = vadd.f32 %v2948_v34, %v2947_v33  ;;  %v2950_v36 = vpop.f32.mrb[14].mxu0  ;;  %v2969_v38 = vpop.f32.mrb[12].mxu1 }
 0x158   :  { %v2951_v39 = vpop.f32.mrb[15].mxu0  ;;  %v2970_v42 = vpop.f32.mrb[13].mxu1 }
 0x159   :  { %v2067_v40 = vadd.f32 %v2949_v35, %v2026_v23  ;;  %v2952_v41 = vadd.f32 %v2951_v39, %v2950_v36  ;;  %v2971_v43 = vadd.f32 %v2970_v42, %v2969_v38  ;;  %v2972_v44 = vpop.f32.mrb[14].mxu1 }
 0x15a   :  { %v2973_v46 = vpop.f32.mrb[15].mxu1 }
 0x15b   :  { %v2070_v45 = vadd.f32 %v2952_v41, %v2029_v25  ;;  %v2108_v47 = vadd.f32 %v2971_v43, %v2067_v40  ;;  %v2974_v48 = vadd.f32 %v2973_v46, %v2972_v44 }
 0x15d   :  { %v2111_v49 = vadd.f32 %v2974_v48, %v2070_v45 }
 0x175   :  { %v2991_v50 = vpop.f32.mrb[16].mxu0 }
 0x176   :  { %v2992_v51 = vpop.f32.mrb[17].mxu0 }
 0x177   :  { %v2993_v52 = vadd.f32 %v2992_v51, %v2991_v50  ;;  %v2994_v53 = vpop.f32.mrb[18].mxu0  ;;  %v3013_v56 = vpop.f32.mrb[16].mxu1 }
 0x178   :  { %v2995_v54 = vpop.f32.mrb[19].mxu0  ;;  %v3014_v58 = vpop.f32.mrb[17].mxu1 }
 0x179   :  { %v2149_v55 = vadd.f32 %v2993_v52, %v2108_v47  ;;  %v2996_v57 = vadd.f32 %v2995_v54, %v2994_v53  ;;  %v3015_v60 = vadd.f32 %v3014_v58, %v3013_v56  ;;  %v3016_v61 = vpop.f32.mrb[18].mxu1 }
 0x17a   :  { %v3017_v62 = vpop.f32.mrb[19].mxu1 }
 0x17b   :  { %v2152_v59 = vadd.f32 %v2996_v57, %v2111_v49  ;;  %v2190_v63 = vadd.f32 %v3015_v60, %v2149_v55  ;;  %v3018_v0 = vadd.f32 %v3017_v62, %v3016_v61 }
 0x17d   :  { %v2193_v1 = vadd.f32 %v3018_v0, %v2152_v59 }
 0x195   :  { %v3035_v2 = vpop.f32.mrb[20].mxu0 }
 0x196   :  { %v3036_v3 = vpop.f32.mrb[21].mxu0 }
 0x197   :  { %v3037_v4 = vadd.f32 %v3036_v3, %v3035_v2  ;;  %v3038_v5 = vpop.f32.mrb[22].mxu0  ;;  %v3057_v6 = vpop.f32.mrb[20].mxu1 }
 0x198   :  { %v3039_v7 = vpop.f32.mrb[23].mxu0  ;;  %v3058_v10 = vpop.f32.mrb[21].mxu1 }
 0x199   :  { %v2231_v8 = vadd.f32 %v3037_v4, %v2190_v63  ;;  %v3040_v9 = vadd.f32 %v3039_v7, %v3038_v5  ;;  %v3059_v11 = vadd.f32 %v3058_v10, %v3057_v6  ;;  %v3060_v12 = vpop.f32.mrb[22].mxu1 }
 0x19a   :  { %v3061_v14 = vpop.f32.mrb[23].mxu1 }
 0x19b   :  { %v2234_v13 = vadd.f32 %v3040_v9, %v2193_v1  ;;  %v3062_v15 = vadd.f32 %v3061_v14, %v3060_v12  ;;  %v2272_v16 = vadd.f32 %v3059_v11, %v2231_v8 }
 0x19d   :  { %v2275_v17 = vadd.f32 %v3062_v15, %v2234_v13 }
 0x1b5   :  { %v2312_v18 = vpop.f32.mrb[24].mxu0 }
 0x1b6   :  { %v2313_v19 = vadd.f32 %v2312_v18, %v2272_v16  ;;  %v3108_v20 = vpop.f32.mrb[25].mxu0 }
 0x1b7   :  { %v2315_v21 = vpop.f32.mrb[26].mxu0 }
 0x1b8   :  { %v2316_v23 = vadd.f32 %v2315_v21, %v2275_v17  ;;  %v3109_v24 = vpop.f32.mrb[27].mxu0  ;;  %v2319_v25 = vmax.f32 %v2313_v19, 0.0 }
 0x1ba   :  { %v2320_v26 = vmax.f32 %v2316_v23, 0.0 }
 0x1bc   :  { %v2321_v27 = vpack.c.bf16 %v2320_v26, %v2319_v25 }
 0x1be   :  { %3127 = vmatmul.mubr.bf16.vlgmr.msra.gmra.mrb[24].mxu1 %v2321_v27 }
 0x291   :  { %v2427_v31 = vpop.f32.mrb[24].mxu1 }
 0x292   :  { %v2428_v32 = vadd.f32 %v2781_v30, %v2427_v31  ;;  %v3128_v33 = vpop.f32.mrb[25].mxu1 }
 0x293   :  { %v2430_v34 = vpop.f32.mrb[26].mxu1 }
 0x294   :  { %v2431_v35 = vadd.f32 %v2781_v30, %v2430_v34  ;;  %v3129_v36 = vpop.f32.mrb[27].mxu1  ;;  %v2434_v37 = vmax.f32 %v2428_v32, 0.0 }
 0x296   :  { %v2435_v38 = vmax.f32 %v2431_v35, 0.0 }
 0x298   :  { %v2436_v39 = vpack.c.bf16 %v2435_v38, %v2434_v37 }
 0x29a   :  { %3147 = vmatmul.mubr.bf16.vlgmr.msra.gmra.mrb[28].mxu0 %v2436_v39 }
 0x36d   :  { %v2542_v40 = vpop.f32.mrb[28].mxu0 }
 0x36e   :  { %v2543_v41 = vadd.f32 %v2790_v22, %v2542_v40  ;;  %v3148_v42 = vpop.f32.mrb[29].mxu0 }
 0x36f   :  { %v2545_v43 = vpop.f32.mrb[30].mxu0 }
 0x370   :  { %2549 = vst [vmem:[%s4222_s7] sm:$0xff] %v2543_v41  ;;  %v2546_v44 = vadd.f32 %v2790_v22, %v2545_v43  ;;  %v3149_v45 = vpop.f32.mrb[31].mxu0 }
 0x372   :  { %2550 = vst [vmem:[%s4222_s7 + $0x8] sm:$0xff] %v2546_v44 }

</bundles_post_ra>
